<compile_context>
chip_gen: v7x
topology: tpu7x:2x2x1
jax: 0.10.0
libtpu: 0.0.40
codegen_flags: <defaults>
</compile_context>

<pallas_src>
import functools

import numpy as np
import jax
import jax.numpy as jnp
from jax.experimental import pallas as pl
from jax.experimental.pallas import tpu as pltpu


# -----------------------------------------------------------------------------
# Static layout constants
# -----------------------------------------------------------------------------
H_LSTM = 128
IN_FEATS = 3 * 7 * 7            # 147 flattened NCHW input features
IN_PAD = 256                    # conv1 matmul K padded to a lane multiple
STATE_W = IN_PAD + 2 * H_LSTM   # 512 = [x_pad | h | c]
OUT_W = 384                     # 128 (h') + 128 (c') + 128 (probs|value|pad)

WA_ROWS, WA_COLS = 512, 512     # [conv1 lowered (256 rows) ; LSTM (256 rows)]
WB_ROWS, WB_COLS = 768, 256     # [conv2 lowered (512 rows) ; conv3 | heads]
B_ROWS = 40                     # 5 bias rows, each on an 8-aligned sublane


# -----------------------------------------------------------------------------
# Fused kernel: conv1 -> conv2 -> conv3 -> LSTMCell -> actor(softmax) + critic
# -----------------------------------------------------------------------------
def _fused_kernel(num_actions, s_ref, wa_ref, wb_ref, b_ref, o_ref):
    f32 = jnp.float32
    na1 = num_actions + 1

    def dot(a, b):
        return jnp.dot(a, b, preferred_element_type=f32)

    def elu(v):
        # ELU(alpha=1): x if x > 0 else exp(x)-1 (clamp exp arg; exp kept
        # instead of expm1 for guaranteed Mosaic lowering).
        return jnp.where(v > 0.0, v, jnp.exp(jnp.minimum(v, 0.0)) - 1.0)

    x = s_ref[:, 0:256]                  # (1,256) zero-padded flat NCHW image
    h0 = s_ref[:, 256:384]               # (1,128) previous hidden
    c0 = s_ref[:, 384:512]               # (1,128) previous cell

    # conv1 (3->32, k3 s2 p1) as lowered dense matmul + ELU -> (16 pos, 32 ch)
    a1 = elu(dot(x, wa_ref[0:256, :]) + b_ref[0:1, :])                   # (1,512)
    # conv2 (32->64, k3 s2 p1) -> (4 pos, 64 ch)
    a2 = elu(dot(a1, wb_ref[0:512, :]) + b_ref[8:9, 0:256])              # (1,256)
    # conv3 (64->128, k2) -> base embedding
    emb = elu(dot(a2, wb_ref[512:768, 0:128]) + b_ref[16:17, 0:128])     # (1,128)

    # LSTMCell(128,128): one matmul for all gates (PyTorch order i, f, g, o)
    xh = jnp.concatenate([emb, h0], axis=1)                              # (1,256)
    gates = dot(xh, wa_ref[256:512, :]) + b_ref[24:25, :]                # (1,512)
    i = jax.nn.sigmoid(gates[:, 0:128])
    f = jax.nn.sigmoid(gates[:, 128:256])
    g = jnp.tanh(gates[:, 256:384])
    o = jax.nn.sigmoid(gates[:, 384:512])
    c1 = f * c0 + i * g
    h1 = o * jnp.tanh(c1)

    # actor + critic fused into one (1,128)@(128,128) matmul (cols >= A+1 zero)
    head = dot(h1, wb_ref[512:640, 128:256]) + b_ref[32:33, 0:128]       # (1,128)
    logits = head[:, 0:num_actions]
    value = head[:, num_actions:na1]
    z = logits - jnp.max(logits, axis=-1, keepdims=True)
    e = jnp.exp(z)
    probs = e * pl.reciprocal(jnp.sum(e, axis=-1, keepdims=True), approx=True)

    # lane-dense packed output: [h1 | c1 | probs | value | zeros] -> (1,384)
    pad = jnp.zeros((1, 128 - na1), f32)
    o_ref[...] = jnp.concatenate([h1, c1, probs, value, pad], axis=1)


def _fused_call(state, w_a, w_b, bias, num_actions):
    kernel = functools.partial(_fused_kernel, num_actions)
    return pl.pallas_call(
        kernel,
        out_shape=jax.ShapeDtypeStruct((1, OUT_W), jnp.float32),
        grid=(1,),
        in_specs=[
            pl.BlockSpec((1, STATE_W), lambda i: (0, 0)),
            pl.BlockSpec((WA_ROWS, WA_COLS), lambda i: (0, 0)),
            pl.BlockSpec((WB_ROWS, WB_COLS), lambda i: (0, 0)),
            pl.BlockSpec((B_ROWS, WA_COLS), lambda i: (0, 0)),
        ],
        out_specs=pl.BlockSpec((1, OUT_W), lambda i: (0, 0)),
        compiler_params=pltpu.CompilerParams(
            dimension_semantics=("arbitrary",)),
    )(state, w_a, w_b, bias)


# -----------------------------------------------------------------------------
# Forward wrapper (jitted): tiny pack/slice glue around a single pallas_call
# -----------------------------------------------------------------------------
@functools.partial(jax.jit, static_argnames=("num_actions",))
def minigrid_forward(w_a, w_b, bias, x, h, c, *, num_actions):
    # x: (1, 3, 7, 7) NCHW float32 (MiniGrid obs after preprocess()).
    x_flat = x.reshape(1, IN_FEATS)
    state = jnp.concatenate(
        [x_flat, jnp.zeros((1, IN_PAD - IN_FEATS), jnp.float32), h, c], axis=1)
    packed = _fused_call(state, w_a, w_b, bias, num_actions)
    h1 = packed[:, 0:128]
    c1 = packed[:, 128:256]
    probs = packed[:, 256:256 + num_actions]
    value = packed[:, 256 + num_actions:256 + num_actions + 1]
    return probs, value, (h1, c1)


# -----------------------------------------------------------------------------
# Parameter construction (PyTorch layout, deterministic) + one-time repacking
# -----------------------------------------------------------------------------
def init_params(key, num_actions):
    ks = jax.random.split(key, 12)

    def lin_init(k, shape, fan_in):
        return jax.random.normal(k, shape, jnp.float32) / jnp.sqrt(float(fan_in))

    p = {}
    p["conv1_w"] = lin_init(ks[0], (32, 3, 3, 3), 27)        # Conv2d(3,32,k3,s2,p1)
    p["conv1_b"] = lin_init(ks[1], (32,), 27)
    p["conv2_w"] = lin_init(ks[2], (64, 32, 3, 3), 288)      # Conv2d(32,64,k3,s2,p1)
    p["conv2_b"] = lin_init(ks[3], (64,), 288)
    p["conv3_w"] = lin_init(ks[4], (128, 64, 2, 2), 256)     # Conv2d(64,128,k2)
    p["conv3_b"] = lin_init(ks[5], (128,), 256)
    p["w_ih"] = lin_init(ks[6], (512, 128), 128)             # LSTMCell(128,128)
    p["w_hh"] = lin_init(ks[7], (512, 128), 128)
    p["b_ih"] = lin_init(ks[8], (512,), 128)
    p["b_hh"] = lin_init(ks[9], (512,), 128)
    p["w_actor"] = lin_init(ks[10], (num_actions, 128), 128)  # Linear(128, A)
    p["b_actor"] = jnp.zeros((num_actions,), jnp.float32)
    p["w_critic"] = lin_init(ks[11], (1, 128), 128)           # Linear(128, 1)
    p["b_critic"] = jnp.zeros((1,), jnp.float32)
    return p


def _lower_conv(w, b, h_in, w_in, stride, pad, channel_major_in):
    """Fold a conv layer (batch=1) into a dense matrix: y_flat = x_flat @ A + b_tiled.

    Output indexing: position-major / channel-minor (p_out*C_out + oc).
    Input indexing: NCHW channel-major (ic*H*W + p) if channel_major_in,
    else position-major / channel-minor (p_in*C_in + ic).  Conv zero-padding
    shows up as zero rows; exact same linear map as the convolution.
    """
    w = np.asarray(w, np.float32)
    b = np.asarray(b, np.float32)
    c_out, c_in, k, _ = w.shape
    h_out = (h_in + 2 * pad - k) // stride + 1
    w_out = (w_in + 2 * pad - k) // stride + 1
    A = np.zeros((h_in * w_in * c_in, h_out * w_out * c_out), np.float32)
    for oh in range(h_out):
        for ow in range(w_out):
            po = oh * w_out + ow
            for kh in range(k):
                for kw in range(k):
                    ih = oh * stride + kh - pad
                    iw = ow * stride + kw - pad
                    if not (0 <= ih < h_in and 0 <= iw < w_in):
                        continue
                    pi = ih * w_in + iw
                    for ic in range(c_in):
                        row = ic * h_in * w_in + pi if channel_major_in else pi * c_in + ic
                        A[row, po * c_out:(po + 1) * c_out] += w[:, ic, kh, kw]
    return A, np.tile(b, h_out * w_out), h_out, w_out


def prepare_params(p, num_actions):
    """One-time repack of PyTorch-layout params into three kernel-ready buffers."""
    a1, b1t, ho1, wo1 = _lower_conv(p["conv1_w"], p["conv1_b"], 7, 7, 2, 1, True)
    a2, b2t, ho2, wo2 = _lower_conv(p["conv2_w"], p["conv2_b"], ho1, wo1, 2, 1, False)
    a3, b3t, ho3, wo3 = _lower_conv(p["conv3_w"], p["conv3_b"], ho2, wo2, 1, 0, False)
    assert a1.shape == (IN_FEATS, 512) and a2.shape == (512, 256)
    assert a3.shape == (256, 128) and (ho3, wo3) == (1, 1)

    w_lstm = np.concatenate([np.asarray(p["w_ih"]).T, np.asarray(p["w_hh"]).T], axis=0)
    b_lstm = np.asarray(p["b_ih"]) + np.asarray(p["b_hh"])
    w_heads = np.concatenate([np.asarray(p["w_actor"]).T, np.asarray(p["w_critic"]).T], axis=1)
    b_heads = np.concatenate([np.asarray(p["b_actor"]), np.asarray(p["b_critic"])])

    # w_a: [conv1 lowered ; LSTM [W_ih;W_hh]]  (512, 512)
    w_a = np.zeros((WA_ROWS, WA_COLS), np.float32)
    w_a[0:IN_FEATS, :] = a1                     # rows 147..255 stay 0 = input pad
    w_a[256:512, :] = w_lstm

    # w_b: [conv2 lowered ; conv3 | heads]     (768, 256)
    w_b = np.zeros((WB_ROWS, WB_COLS), np.float32)
    w_b[0:512, 0:256] = a2
    w_b[512:768, 0:128] = a3
    w_b[512:640, 128:128 + num_actions + 1] = w_heads

    bias = np.zeros((B_ROWS, WA_COLS), np.float32)
    bias[0, 0:512] = b1t
    bias[8, 0:256] = b2t
    bias[16, 0:128] = b3t
    bias[24, 0:512] = b_lstm
    bias[32, 0:num_actions + 1] = b_heads
    return jnp.asarray(w_a), jnp.asarray(w_b), jnp.asarray(bias)


# -----------------------------------------------------------------------------
# Plain-JAX reference of the original PyTorch module (for validation only)
# -----------------------------------------------------------------------------
def reference_forward(p, x, h, c, num_actions):
    def conv(inp, w, b, stride, pad):
        out = jax.lax.conv_general_dilated(
            inp, w, window_strides=(stride, stride),
            padding=[(pad, pad), (pad, pad)],
            dimension_numbers=("NCHW", "OIHW", "NCHW"))
        return out + b.reshape(1, -1, 1, 1)

    elu = lambda v: jnp.where(v > 0, v, jnp.exp(jnp.minimum(v, 0.0)) - 1.0)
    y = elu(conv(x, p["conv1_w"], p["conv1_b"], 2, 1))
    y = elu(conv(y, p["conv2_w"], p["conv2_b"], 2, 1))
    y = elu(conv(y, p["conv3_w"], p["conv3_b"], 1, 0))
    emb = y.reshape(1, 128)
    gates = emb @ p["w_ih"].T + h @ p["w_hh"].T + p["b_ih"] + p["b_hh"]
    i = jax.nn.sigmoid(gates[:, 0:128]); f = jax.nn.sigmoid(gates[:, 128:256])
    g = jnp.tanh(gates[:, 256:384]); o = jax.nn.sigmoid(gates[:, 384:512])
    c1 = f * c + i * g
    h1 = o * jnp.tanh(c1)
    probs = jax.nn.softmax(h1 @ p["w_actor"].T + p["b_actor"], axis=-1)
    value = h1 @ p["w_critic"].T + p["b_critic"]
    return probs, value, h1, c1


if __name__ == "__main__":
    NUM_ACTIONS = 7  # MiniGrid action space

    key = jax.random.PRNGKey(0)
    k_param, k_img = jax.random.split(key)
    params = init_params(k_param, NUM_ACTIONS)
    w_a, w_b, bias = prepare_params(params, NUM_ACTIONS)   # one-time repack

    # MiniGrid observation after preprocess(): (1, 3, 7, 7), values in [0, 1]
    x = jax.random.uniform(k_img, (1, 3, 7, 7), jnp.float32)
    # reset_hidden(): [zeros(1,128), zeros(1,128)]
    h0 = jnp.zeros((1, 128), jnp.float32)
    c0 = jnp.zeros((1, 128), jnp.float32)

    probs, value, (h1, c1) = minigrid_forward(
        w_a, w_b, bias, x, h0, c0, num_actions=NUM_ACTIONS)
    jax.block_until_ready((probs, value, h1, c1))

    assert probs.shape == (1, NUM_ACTIONS)
    assert value.shape == (1, 1)
    assert h1.shape == (1, 128) and c1.shape == (1, 128)
    assert bool(jnp.all(jnp.isfinite(probs))) and bool(jnp.all(jnp.isfinite(value)))
    assert abs(float(jnp.sum(probs)) - 1.0) < 2e-3   # approx-reciprocal softmax

    # Validate the fused kernel against the plain-JAX reference of the module.
    rp, rv, rh, rc = reference_forward(params, x, h0, c0, NUM_ACTIONS)
    for got, ref in ((probs, rp), (value, rv), (h1, rh), (c1, rc)):
        assert bool(jnp.allclose(got, ref, atol=5e-3, rtol=5e-3))

    # Second step exercises the carried recurrent state.
    probs2, value2, (h2, c2) = minigrid_forward(
        w_a, w_b, bias, x, h1, c1, num_actions=NUM_ACTIONS)
    jax.block_until_ready((probs2, value2, h2, c2))
    assert bool(jnp.all(jnp.isfinite(probs2))) and bool(jnp.all(jnp.isfinite(value2)))

    print("KERNEL_OK")
</pallas_src>

<mosaic_0001>
module attributes {stable_mosaic.version = 11 : i64} {
  func.func @_fused_kernel(%arg0: i32, %arg1: memref<1x512xf32, #tpu.memory_space<vmem>>, %arg2: memref<512x512xf32, #tpu.memory_space<vmem>>, %arg3: memref<768x256xf32, #tpu.memory_space<vmem>>, %arg4: memref<40x512xf32, #tpu.memory_space<vmem>>, %arg5: memref<1x384xf32, #tpu.memory_space<vmem>>) attributes {dimension_semantics = [#tpu.dimension_semantics<arbitrary>], iteration_bounds = array<i64: 1>, scalar_prefetch = 0 : i64, scratch_operands = 0 : i64, tpu.core_type = #tpu.core_type<tc>, window_params = [{pipeline_mode = #tpu.pipeline_mode<synchronous>, transform_indices = @transform_0, window_bounds = array<i64: 1, 512>}, {pipeline_mode = #tpu.pipeline_mode<synchronous>, transform_indices = @transform_1, window_bounds = array<i64: 512, 512>}, {pipeline_mode = #tpu.pipeline_mode<synchronous>, transform_indices = @transform_2, window_bounds = array<i64: 768, 256>}, {pipeline_mode = #tpu.pipeline_mode<synchronous>, transform_indices = @transform_3, window_bounds = array<i64: 40, 512>}, {pipeline_mode = #tpu.pipeline_mode<synchronous>, transform_indices = @transform_4, window_bounds = array<i64: 1, 384>}]} {
    %c0 = arith.constant 0 : index
    %c0_0 = arith.constant 0 : index
    %0 = vector.load %arg1[%c0, %c0_0] : memref<1x512xf32, #tpu.memory_space<vmem>>, vector<1x256xf32>
    %c0_1 = arith.constant 0 : index
    %c256 = arith.constant 256 : index
    %1 = vector.load %arg1[%c0_1, %c256] : memref<1x512xf32, #tpu.memory_space<vmem>>, vector<1x128xf32>
    %c0_2 = arith.constant 0 : index
    %c384 = arith.constant 384 : index
    %2 = vector.load %arg1[%c0_2, %c384] : memref<1x512xf32, #tpu.memory_space<vmem>>, vector<1x128xf32>
    %c0_3 = arith.constant 0 : index
    %c0_4 = arith.constant 0 : index
    %3 = vector.load %arg2[%c0_3, %c0_4] : memref<512x512xf32, #tpu.memory_space<vmem>>, vector<256x512xf32>
    %cst = arith.constant dense<0.000000e+00> : vector<1x512xf32>
    %4 = tpu.matmul %0, %3, %cst {dimension_numbers = #tpu.dot_dimension_numbers<[1], [0], [0], [1], [0, 0, 1, 1], [], []>} : vector<1x256xf32>, vector<256x512xf32>, vector<1x512xf32> -> vector<1x512xf32>
    %c0_5 = arith.constant 0 : index
    %c0_6 = arith.constant 0 : index
    %5 = vector.load %arg4[%c0_5, %c0_6] : memref<40x512xf32, #tpu.memory_space<vmem>>, vector<1x512xf32>
    %6 = arith.addf %4, %5 : vector<1x512xf32>
    %cst_7 = arith.constant 0.000000e+00 : f32
    %7 = vector.broadcast %cst_7 : f32 to vector<1x512xf32>
    %8 = arith.cmpf ogt, %6, %7 : vector<1x512xf32>
    %cst_8 = arith.constant 0.000000e+00 : f32
    %9 = vector.broadcast %cst_8 : f32 to vector<1x512xf32>
    %10 = arith.minimumf %6, %9 : vector<1x512xf32>
    %11 = math.exp %10 : vector<1x512xf32>
    %cst_9 = arith.constant 1.000000e+00 : f32
    %12 = vector.broadcast %cst_9 : f32 to vector<1x512xf32>
    %13 = arith.subf %11, %12 : vector<1x512xf32>
    %14 = arith.select %8, %6, %13 : vector<1x512xi1>, vector<1x512xf32>
    %c0_10 = arith.constant 0 : index
    %c0_11 = arith.constant 0 : index
    %15 = vector.load %arg3[%c0_10, %c0_11] : memref<768x256xf32, #tpu.memory_space<vmem>>, vector<512x256xf32>
    %cst_12 = arith.constant dense<0.000000e+00> : vector<1x256xf32>
    %16 = tpu.matmul %14, %15, %cst_12 {dimension_numbers = #tpu.dot_dimension_numbers<[1], [0], [0], [1], [0, 0, 1, 1], [], []>} : vector<1x512xf32>, vector<512x256xf32>, vector<1x256xf32> -> vector<1x256xf32>
    %c8 = arith.constant 8 : index
    %c0_13 = arith.constant 0 : index
    %17 = vector.load %arg4[%c8, %c0_13] : memref<40x512xf32, #tpu.memory_space<vmem>>, vector<1x256xf32>
    %18 = arith.addf %16, %17 : vector<1x256xf32>
    %cst_14 = arith.constant 0.000000e+00 : f32
    %19 = vector.broadcast %cst_14 : f32 to vector<1x256xf32>
    %20 = arith.cmpf ogt, %18, %19 : vector<1x256xf32>
    %cst_15 = arith.constant 0.000000e+00 : f32
    %21 = vector.broadcast %cst_15 : f32 to vector<1x256xf32>
    %22 = arith.minimumf %18, %21 : vector<1x256xf32>
    %23 = math.exp %22 : vector<1x256xf32>
    %cst_16 = arith.constant 1.000000e+00 : f32
    %24 = vector.broadcast %cst_16 : f32 to vector<1x256xf32>
    %25 = arith.subf %23, %24 : vector<1x256xf32>
    %26 = arith.select %20, %18, %25 : vector<1x256xi1>, vector<1x256xf32>
    %c512 = arith.constant 512 : index
    %c0_17 = arith.constant 0 : index
    %27 = vector.load %arg3[%c512, %c0_17] : memref<768x256xf32, #tpu.memory_space<vmem>>, vector<256x128xf32>
    %cst_18 = arith.constant dense<0.000000e+00> : vector<1x128xf32>
    %28 = tpu.matmul %26, %27, %cst_18 {dimension_numbers = #tpu.dot_dimension_numbers<[1], [0], [0], [1], [0, 0, 1, 1], [], []>} : vector<1x256xf32>, vector<256x128xf32>, vector<1x128xf32> -> vector<1x128xf32>
    %c16 = arith.constant 16 : index
    %c0_19 = arith.constant 0 : index
    %29 = vector.load %arg4[%c16, %c0_19] : memref<40x512xf32, #tpu.memory_space<vmem>>, vector<1x128xf32>
    %30 = arith.addf %28, %29 : vector<1x128xf32>
    %cst_20 = arith.constant 0.000000e+00 : f32
    %31 = vector.broadcast %cst_20 : f32 to vector<1x128xf32>
    %32 = arith.cmpf ogt, %30, %31 : vector<1x128xf32>
    %cst_21 = arith.constant 0.000000e+00 : f32
    %33 = vector.broadcast %cst_21 : f32 to vector<1x128xf32>
    %34 = arith.minimumf %30, %33 : vector<1x128xf32>
    %35 = math.exp %34 : vector<1x128xf32>
    %cst_22 = arith.constant 1.000000e+00 : f32
    %36 = vector.broadcast %cst_22 : f32 to vector<1x128xf32>
    %37 = arith.subf %35, %36 : vector<1x128xf32>
    %38 = arith.select %32, %30, %37 : vector<1x128xi1>, vector<1x128xf32>
    %39 = tpu.concatenate %38, %1 in 1 : vector<1x128xf32>, vector<1x128xf32> -> vector<1x256xf32>
    %c256_23 = arith.constant 256 : index
    %c0_24 = arith.constant 0 : index
    %40 = vector.load %arg2[%c256_23, %c0_24] : memref<512x512xf32, #tpu.memory_space<vmem>>, vector<256x512xf32>
    %cst_25 = arith.constant dense<0.000000e+00> : vector<1x512xf32>
    %41 = tpu.matmul %39, %40, %cst_25 {dimension_numbers = #tpu.dot_dimension_numbers<[1], [0], [0], [1], [0, 0, 1, 1], [], []>} : vector<1x256xf32>, vector<256x512xf32>, vector<1x512xf32> -> vector<1x512xf32>
    %c24 = arith.constant 24 : index
    %c0_26 = arith.constant 0 : index
    %42 = vector.load %arg4[%c24, %c0_26] : memref<40x512xf32, #tpu.memory_space<vmem>>, vector<1x512xf32>
    %43 = arith.addf %41, %42 : vector<1x512xf32>
    %44 = vector.extract_strided_slice %43 {offsets = [0, 0], sizes = [1, 128], strides = [1, 1]} : vector<1x512xf32> to vector<1x128xf32>
    %45 = arith.negf %44 : vector<1x128xf32>
    %46 = math.exp %45 : vector<1x128xf32>
    %cst_27 = arith.constant 1.000000e+00 : f32
    %47 = vector.broadcast %cst_27 : f32 to vector<1x128xf32>
    %48 = arith.addf %47, %46 : vector<1x128xf32>
    %49 = arith.divf %47, %48 : vector<1x128xf32>
    %50 = vector.extract_strided_slice %43 {offsets = [0, 128], sizes = [1, 128], strides = [1, 1]} : vector<1x512xf32> to vector<1x128xf32>
    %51 = arith.negf %50 : vector<1x128xf32>
    %52 = math.exp %51 : vector<1x128xf32>
    %cst_28 = arith.constant 1.000000e+00 : f32
    %53 = vector.broadcast %cst_28 : f32 to vector<1x128xf32>
    %54 = arith.addf %53, %52 : vector<1x128xf32>
    %55 = arith.divf %53, %54 : vector<1x128xf32>
    %56 = vector.extract_strided_slice %43 {offsets = [0, 256], sizes = [1, 128], strides = [1, 1]} : vector<1x512xf32> to vector<1x128xf32>
    %57 = math.tanh %56 : vector<1x128xf32>
    %58 = vector.extract_strided_slice %43 {offsets = [0, 384], sizes = [1, 128], strides = [1, 1]} : vector<1x512xf32> to vector<1x128xf32>
    %59 = arith.negf %58 : vector<1x128xf32>
    %60 = math.exp %59 : vector<1x128xf32>
    %cst_29 = arith.constant 1.000000e+00 : f32
    %61 = vector.broadcast %cst_29 : f32 to vector<1x128xf32>
    %62 = arith.addf %61, %60 : vector<1x128xf32>
    %63 = arith.divf %61, %62 : vector<1x128xf32>
    %64 = arith.mulf %55, %2 : vector<1x128xf32>
    %65 = arith.mulf %49, %57 : vector<1x128xf32>
    %66 = arith.addf %64, %65 : vector<1x128xf32>
    %67 = math.tanh %66 : vector<1x128xf32>
    %68 = arith.mulf %63, %67 : vector<1x128xf32>
    %c512_30 = arith.constant 512 : index
    %c128 = arith.constant 128 : index
    %69 = vector.load %arg3[%c512_30, %c128] : memref<768x256xf32, #tpu.memory_space<vmem>>, vector<128x128xf32>
    %cst_31 = arith.constant dense<0.000000e+00> : vector<1x128xf32>
    %70 = tpu.matmul %68, %69, %cst_31 {dimension_numbers = #tpu.dot_dimension_numbers<[1], [0], [0], [1], [0, 0, 1, 1], [], []>} : vector<1x128xf32>, vector<128x128xf32>, vector<1x128xf32> -> vector<1x128xf32>
    %c32 = arith.constant 32 : index
    %c0_32 = arith.constant 0 : index
    %71 = vector.load %arg4[%c32, %c0_32] : memref<40x512xf32, #tpu.memory_space<vmem>>, vector<1x128xf32>
    %72 = arith.addf %70, %71 : vector<1x128xf32>
    %73 = vector.extract_strided_slice %72 {offsets = [0, 0], sizes = [1, 7], strides = [1, 1]} : vector<1x128xf32> to vector<1x7xf32>
    %74 = vector.extract_strided_slice %72 {offsets = [0, 7], sizes = [1, 1], strides = [1, 1]} : vector<1x128xf32> to vector<1x1xf32>
    %cst_33 = arith.constant dense<0xFF800000> : vector<1xf32>
    %75 = vector.multi_reduction <maximumf>, %73, %cst_33 [1] : vector<1x7xf32> to vector<1xf32>
    %76 = vector.shape_cast %75 : vector<1xf32> to vector<1x1xf32>
    %77 = vector.broadcast %76 : vector<1x1xf32> to vector<1x7xf32>
    %78 = arith.subf %73, %77 : vector<1x7xf32>
    %79 = math.exp %78 : vector<1x7xf32>
    %cst_34 = arith.constant dense<0.000000e+00> : vector<1xf32>
    %80 = vector.multi_reduction <add>, %79, %cst_34 [1] : vector<1x7xf32> to vector<1xf32>
    %81 = vector.shape_cast %80 : vector<1xf32> to vector<1x1xf32>
    %82 = tpu.reciprocal %81 {approx = true} : vector<1x1xf32> -> vector<1x1xf32>
    %83 = vector.broadcast %82 : vector<1x1xf32> to vector<1x7xf32>
    %84 = arith.mulf %79, %83 : vector<1x7xf32>
    %cst_35 = arith.constant 0.000000e+00 : f32
    %85 = vector.broadcast %cst_35 : f32 to vector<1x120xf32>
    %86 = tpu.concatenate %68, %66, %84, %74, %85 in 1 : vector<1x128xf32>, vector<1x128xf32>, vector<1x7xf32>, vector<1x1xf32>, vector<1x120xf32> -> vector<1x384xf32>
    %c0_36 = arith.constant 0 : index
    %c0_37 = arith.constant 0 : index
    %87 = vector.load %arg5[%c0_36, %c0_37] : memref<1x384xf32, #tpu.memory_space<vmem>>, vector<1x384xf32>
    tpu.vector_store %arg5[%c0_36, %c0_37], %86 {strides = array<i32>} : memref<1x384xf32, #tpu.memory_space<vmem>>, vector<1x384xf32>,
    return
  }
  func.func @transform_0(%arg0: i32) -> (i32, i32) {
    %c0_i32 = arith.constant 0 : i32
    %c0_i32_0 = arith.constant 0 : i32
    %c0_i32_1 = arith.constant 0 : i32
    return %c0_i32, %c0_i32_0 : i32, i32
  }
  func.func @transform_1(%arg0: i32) -> (i32, i32) {
    %c0_i32 = arith.constant 0 : i32
    %c0_i32_0 = arith.constant 0 : i32
    %c0_i32_1 = arith.constant 0 : i32
    return %c0_i32, %c0_i32_0 : i32, i32
  }
  func.func @transform_2(%arg0: i32) -> (i32, i32) {
    %c0_i32 = arith.constant 0 : i32
    %c0_i32_0 = arith.constant 0 : i32
    %c0_i32_1 = arith.constant 0 : i32
    return %c0_i32, %c0_i32_0 : i32, i32
  }
  func.func @transform_3(%arg0: i32) -> (i32, i32) {
    %c0_i32 = arith.constant 0 : i32
    %c0_i32_0 = arith.constant 0 : i32
    %c0_i32_1 = arith.constant 0 : i32
    return %c0_i32, %c0_i32_0 : i32, i32
  }
  func.func @transform_4(%arg0: i32) -> (i32, i32) {
    %c0_i32 = arith.constant 0 : i32
    %c0_i32_0 = arith.constant 0 : i32
    %c0_i32_1 = arith.constant 0 : i32
    return %c0_i32, %c0_i32_0 : i32, i32
  }
}

</mosaic_0001>

<bundles_post_ra>
// kernel: minigrid_forward.1
= control target key start
LH: loop header
LB: loop body
LE: loop exit
PB: predicated region body
PF: predicated region fallthrough
CT: control target
= control target key end

     0   :  { %9 = vsyncpa [#allocation3], 0  ;;  %s2040_s0 = inlined_call_operand.vmem [shape: f32[1,512], index: 0, kind: input, shape index: {}]   ;;  %s2041_s1 = inlined_call_operand.hbm [shape: f32[512,512], index: 1, kind: input, shape index: {}]   ;;  %s2042_s2 = inlined_call_operand.hbm [shape: f32[768,256], index: 2, kind: input, shape index: {}]   ;;  %s2043_s3 = inlined_call_operand.hbm [shape: f32[40,512], index: 3, kind: input, shape index: {}]   ;;  %s2044_s4 = inlined_call_operand.vmem [shape: f32[1,384], index: 4, kind: output, shape index: {}]  }
   0x1   :  { %10 = vsyncpa [#allocation5], 0  ;;  %s1906_s15 = smov [#allocation4]   ;;  %s1836_s19 = scalar_lea.hbm %s2042_s2, 24576 }
   0x2   :  { %s30_s16 = sshll.u32 %s1906_s15, 4  ;;  %p1837_p0 = scmp.ne.s32.totalorder %s2042_s2, %s1836_s19  ;;  %s31_s16 = int_to_ptr.vmem [resolvable:$true] %s30_s16 }
   0x3   :  { %p1840_p1 = scmp.lt.u32.totalorder %s1836_s19, %s2042_s2 }
   0x5   :  { %p1842_p2 = pnand %p1840_p1, %p1837_p0 }
   0x7   :  { %1845 = shalt.err (!%p1842_p2)
}
   0x8   :  { %s1846_s24 = scalar_lea.vmem %s31_s16, 24576  ;;  %p1851_p4 = scmp.lt.s32.totalorder %s31_s16, %s31_s16 }
   0x9   :  { %p1847_p3 = scmp.ne.s32.totalorder %s31_s16, %s1846_s24  ;;  %p1852_p5 = scmp.lt.s32.totalorder %s1846_s24, %s1846_s24 }
   0xb   :  { %p1853_p6 = por %p1852_p5, %p1851_p4 }
   0xd   :  { %p1854_p7 = pnand %p1853_p6, %p1847_p3 }
   0xf   :  { %1857 = shalt.err (!%p1854_p7)
}
  0x10   :  { %s1907_s25 = smov 256   ;;  %s1908_s26 = smov 16  }
  0x11   :  { %36 = dma.hbm_to_vmem [thread:$0]  %s2042_s2, 24576, %s31_s16, [#allocation5], %s1907_s25, %s1907_s25, %s1908_s26  }
  0x12   :  { %s1909_s29 = smov [#allocation2]   ;;  %s1858_s7 = scalar_lea.hbm %s2041_s1, 32768 }
  0x13   :  { %s18_s30 = sshll.u32 %s1909_s29, 4  ;;  %p1859_p8 = scmp.ne.s32.totalorder %s2041_s1, %s1858_s7  ;;  %s19_s30 = int_to_ptr.vmem [resolvable:$true] %s18_s30 }
  0x14   :  { %p1862_p9 = scmp.lt.u32.totalorder %s1858_s7, %s2041_s1 }
  0x16   :  { %p1864_p10 = pnand %p1862_p9, %p1859_p8 }
  0x18   :  { %1867 = shalt.err (!%p1864_p10)
}
  0x19   :  { %s1868_s12 = scalar_lea.vmem %s19_s30, 32768  ;;  %p1873_p12 = scmp.lt.s32.totalorder %s19_s30, %s19_s30 }
  0x1a   :  { %p1869_p11 = scmp.ne.s32.totalorder %s19_s30, %s1868_s12  ;;  %p1874_p13 = scmp.lt.s32.totalorder %s1868_s12, %s1868_s12 }
  0x1c   :  { %p1875_p0 = por %p1874_p13, %p1873_p12 }
  0x1e   :  { %p1876_p1 = pnand %p1875_p0, %p1869_p11 }
  0x20   :  { %1879 = shalt.err (!%p1876_p1)
}
  0x21   :  { %s1910_s2 = smov 512   ;;  %s1911_s13 = smov 32  }
  0x22   :  { %24 = dma.hbm_to_vmem [thread:$0]  %s2041_s1, 32768, %s19_s30, [#allocation3], %s1910_s2, %s1910_s2, %s1911_s13  }
  0x23   :  { %s1912_s16 = smov [#allocation6]   ;;  %s1880_s20 = scalar_lea.hbm %s2043_s3, 2560 }
  0x24   :  { %s42_s17 = sshll.u32 %s1912_s16, 4  ;;  %p1881_p2 = scmp.ne.s32.totalorder %s2043_s3, %s1880_s20  ;;  %s43_s17 = int_to_ptr.vmem [resolvable:$true] %s42_s17 }
  0x25   :  { %p1884_p3 = scmp.lt.u32.totalorder %s1880_s20, %s2043_s3 }
  0x27   :  { %p1886_p4 = pnand %p1884_p3, %p1881_p2 }
  0x29   :  { %1889 = shalt.err (!%p1886_p4)
}
  0x2a   :  { %s1890_s25 = scalar_lea.vmem %s43_s17, 2560  ;;  %p1895_p6 = scmp.lt.s32.totalorder %s43_s17, %s43_s17 }
  0x2b   :  { %p1891_p5 = scmp.ne.s32.totalorder %s43_s17, %s1890_s25  ;;  %p1896_p7 = scmp.lt.s32.totalorder %s1890_s25, %s1890_s25 }
  0x2d   :  { %p1897_p8 = por %p1896_p7, %p1895_p6 }
  0x2f   :  { %p1898_p9 = pnand %p1897_p8, %p1891_p5 }
  0x31   :  { %1901 = shalt.err (!%p1898_p9)
}
  0x32   :  { %48 = dma.hbm_to_vmem [thread:$0]  %s2043_s3, 2560, %s43_s17, [#allocation5], %s1910_s2, %s1910_s2, %s1911_s13  }
  0x33   :  { %1902 = dma.done.wait [#allocation3], 32768  }
  0x34   :  { %1903 = vsyncadd [#allocation3], 4294934528 }
  0x35   :  { %1904 = dma.done.wait [#allocation5], 27136  }
  0x36   :  { %1905 = vsyncadd [#allocation5], 4294940160  ;;  %v62_v0 = vld [vmem:[#allocation2 + $0x8] sm:$0xff]  ;;  %v61_v2 = vld [vmem:[#allocation2] sm:$0xff]  ;;  %v191_v40 = vlaneseq  ;;  %vm1914_vm7 = vmmov 0   ;;  %vm1196_vm8 = vcmask 49152  }
  0x37   :  { %v66_v1 = vld [vmem:[#allocation2 + $0x28] sm:$0xff]  ;;  %v65_v4 = vld [vmem:[#allocation2 + $0x20] sm:$0xff]  ;;  %v64_v32 = vld [vmem:[#allocation2 + $0x18] sm:$0xff]  ;;  %vm1208_vm9 = vcmask 56320   ;;  %vm1210_vm10 = vcmask 64512  }
  0x38   :  { %v1347_v3 = vpack.c.bf16 %v66_v1, %v62_v0  ;;  %v70_v5 = vld [vmem:[#allocation2 + $0x48] sm:$0xff]  ;;  %v1349_v7 = vpack.c.bf16 %v65_v4, %v61_v2  ;;  %v69_v9 = vld [vmem:[#allocation2 + $0x40] sm:$0xff]  ;;  %v68_v33 = vld [vmem:[#allocation2 + $0x38] sm:$0xff]  ;;  %v1979_v57 = vshrl.u32 %v191_v40, 7  ;;  %vm1241_vm11 = vcmp.lt.s32.totalorder %v191_v40, 384 }
  0x39   :  { %v74_v6 = vld [vmem:[#allocation2 + $0x68] sm:$0xff]  ;;  %v73_v10 = vld [vmem:[#allocation2 + $0x60] sm:$0xff]  ;;  %v63_v34 = vld [vmem:[#allocation2 + $0x10] sm:$0xff]  ;;  %v1411_v38 = vpack.c.bf16 %v68_v33, %v64_v32 }
  0x3a   :  { %v1351_v8 = vpack.c.bf16 %v74_v6, %v70_v5  ;;  %v78_v11 = vld [vmem:[#allocation2 + $0x88] sm:$0xff]  ;;  %1348 = vmatprep.subr.bf16.mxu0 %v1347_v3  ;;  %v1353_v13 = vpack.c.bf16 %v73_v10, %v69_v9  ;;  %v77_v15 = vld [vmem:[#allocation2 + $0x80] sm:$0xff]  ;;  %v67_v39 = vld [vmem:[#allocation2 + $0x30] sm:$0xff] }
  0x3b   :  { %v82_v12 = vld [vmem:[#allocation2 + $0xa8] sm:$0xff]  ;;  %1350 = vmatpush1.bf16.msra.mxu0 %v1349_v7  ;;  %v81_v16 = vld [vmem:[#allocation2 + $0xa0] sm:$0xff]  ;;  %v1413_v43 = vpack.c.bf16 %v67_v39, %v63_v34  ;;  %v72_v44 = vld [vmem:[#allocation2 + $0x58] sm:$0xff]  ;;  %1412 = vmatprep.subr.bf16.mxu1 %v1411_v38 }
  0x3c   :  { %1352 = vmatprep.subr.bf16.mxu0 %v1351_v8  ;;  %v1355_v14 = vpack.c.bf16 %v82_v12, %v78_v11  ;;  %v86_v17 = vld [vmem:[#allocation2 + $0xc8] sm:$0xff]  ;;  %v1357_v19 = vpack.c.bf16 %v81_v16, %v77_v15  ;;  %v85_v21 = vld [vmem:[#allocation2 + $0xc0] sm:$0xff]  ;;  %v76_v45 = vld [vmem:[#allocation2 + $0x78] sm:$0xff]  ;;  %v1982_v8 = vsub.s32 1, %v1979_v57 }
  0x3d   :  { %v90_v18 = vld [vmem:[#allocation2 + $0xe8] sm:$0xff]  ;;  %v89_v22 = vld [vmem:[#allocation2 + $0xe0] sm:$0xff]  ;;  %v71_v46 = vld [vmem:[#allocation2 + $0x50] sm:$0xff]  ;;  %1414 = vmatpush1.bf16.msra.mxu1 %v1413_v43  ;;  %v1415_v51 = vpack.c.bf16 %v76_v45, %v72_v44 }
  0x3e   :  { %v1359_v20 = vpack.c.bf16 %v90_v18, %v86_v17  ;;  %v94_v23 = vld [vmem:[#allocation2 + $0x108] sm:$0xff]  ;;  %v1361_v25 = vpack.c.bf16 %v89_v22, %v85_v21  ;;  %v93_v27 = vld [vmem:[#allocation2 + $0x100] sm:$0xff]  ;;  %v75_v47 = vld [vmem:[#allocation2 + $0x70] sm:$0xff] }
  0x3f   :  { %1354 = vmatpush1.bf16.msra.mxu0 %v1353_v13  ;;  %v98_v24 = vld [vmem:[#allocation2 + $0x128] sm:$0xff]  ;;  %v97_v28 = vld [vmem:[#allocation2 + $0x120] sm:$0xff]  ;;  %v1417_v52 = vpack.c.bf16 %v75_v47, %v71_v46  ;;  %v80_v55 = vld [vmem:[#allocation2 + $0x98] sm:$0xff]  ;;  %1416 = vmatprep.subr.bf16.mxu1 %v1415_v51 }
  0x40   :  { %1356 = vmatprep.subr.bf16.mxu0 %v1355_v14  ;;  %v1363_v26 = vpack.c.bf16 %v98_v24, %v94_v23  ;;  %v102_v29 = vld [vmem:[#allocation2 + $0x148] sm:$0xff]  ;;  %v1365_v31 = vpack.c.bf16 %v97_v28, %v93_v27  ;;  %v101_v36 = vld [vmem:[#allocation2 + $0x140] sm:$0xff]  ;;  %v84_v56 = vld [vmem:[#allocation2 + $0xb8] sm:$0xff] }
  0x41   :  { %v106_v30 = vld [vmem:[#allocation2 + $0x168] sm:$0xff]  ;;  %v105_v37 = vld [vmem:[#allocation2 + $0x160] sm:$0xff]  ;;  %v1419_v59 = vpack.c.bf16 %v84_v56, %v80_v55  ;;  %v79_v60 = vld [vmem:[#allocation2 + $0x90] sm:$0xff]  ;;  %1418 = vmatpush1.bf16.msra.mxu1 %v1417_v52 }
  0x42   :  { %v1367_v35 = vpack.c.bf16 %v106_v30, %v102_v29  ;;  %v110_v41 = vld [vmem:[#allocation2 + $0x188] sm:$0xff]  ;;  %v1369_v48 = vpack.c.bf16 %v105_v37, %v101_v36  ;;  %v109_v49 = vld [vmem:[#allocation2 + $0x180] sm:$0xff]  ;;  %v83_v61 = vld [vmem:[#allocation2 + $0xb0] sm:$0xff] }
  0x43   :  { %1358 = vmatpush1.bf16.msra.mxu0 %v1357_v19  ;;  %v114_v42 = vld [vmem:[#allocation2 + $0x1a8] sm:$0xff]  ;;  %v113_v50 = vld [vmem:[#allocation2 + $0x1a0] sm:$0xff]  ;;  %v1421_v0 = vpack.c.bf16 %v83_v61, %v79_v60  ;;  %v88_v1 = vld [vmem:[#allocation2 + $0xd8] sm:$0xff]  ;;  %1420 = vmatprep.subr.bf16.mxu1 %v1419_v59 }
  0x44   :  { %1360 = vmatprep.subr.bf16.mxu0 %v1359_v20  ;;  %v1371_v53 = vpack.c.bf16 %v114_v42, %v110_v41  ;;  %v118_v54 = vld [vmem:[#allocation2 + $0x1c8] sm:$0xff]  ;;  %v1373_v62 = vpack.c.bf16 %v113_v50, %v109_v49  ;;  %v117_v63 = vld [vmem:[#allocation2 + $0x1c0] sm:$0xff]  ;;  %v92_v2 = vld [vmem:[#allocation2 + $0xf8] sm:$0xff] }
  0x45   :  { %v122_v58 = vld [vmem:[#allocation2 + $0x1e8] sm:$0xff]  ;;  %v121_v4 = vld [vmem:[#allocation2 + $0x1e0] sm:$0xff]  ;;  %v1423_v5 = vpack.c.bf16 %v92_v2, %v88_v1  ;;  %v87_v6 = vld [vmem:[#allocation2 + $0xd0] sm:$0xff]  ;;  %1422 = vmatpush1.bf16.msra.mxu1 %v1421_v0 }
  0x46   :  { %v1375_v3 = vpack.c.bf16 %v122_v58, %v118_v54  ;;  %v91_v7 = vld [vmem:[#allocation2 + $0xf0] sm:$0xff]  ;;  %v126_v9 = vld [vmem:[#allocation2 + $0x208] sm:$0xff]  ;;  %v96_v11 = vld [vmem:[#allocation2 + $0x118] sm:$0xff]  ;;  %v1377_v13 = vpack.c.bf16 %v121_v4, %v117_v63 }
  0x47   :  { %1362 = vmatpush1.bf16.msra.mxu0 %v1361_v25  ;;  %v130_v10 = vld [vmem:[#allocation2 + $0x228] sm:$0xff]  ;;  %v100_v12 = vld [vmem:[#allocation2 + $0x138] sm:$0xff]  ;;  %v125_v14 = vld [vmem:[#allocation2 + $0x200] sm:$0xff]  ;;  %v1425_v16 = vpack.c.bf16 %v91_v7, %v87_v6  ;;  %1424 = vmatprep.subr.bf16.mxu1 %v1423_v5 }
  0x48   :  { %1364 = vmatprep.subr.bf16.mxu0 %v1363_v26  ;;  %v129_v15 = vld [vmem:[#allocation2 + $0x220] sm:$0xff]  ;;  %v1379_v18 = vpack.c.bf16 %v130_v10, %v126_v9  ;;  %v134_v19 = vld [vmem:[#allocation2 + $0x248] sm:$0xff]  ;;  %v1427_v20 = vpack.c.bf16 %v100_v12, %v96_v11  ;;  %v95_v21 = vld [vmem:[#allocation2 + $0x110] sm:$0xff] }
  0x49   :  { %v1987_v17 = vld [vmem:[%s2040_s0] sm:$0x3]  ;;  %v99_v22 = vld [vmem:[#allocation2 + $0x130] sm:$0xff]  ;;  %v138_v24 = vld [vmem:[#allocation2 + $0x268] sm:$0xff]  ;;  %v1381_v27 = vpack.c.bf16 %v129_v15, %v125_v14  ;;  %1426 = vmatpush1.bf16.msra.mxu1 %v1425_v16 }
  0x4a   :  { %v198_v23 = vrot.slane %v1987_v17, %v1982_v8  ;;  %v104_v25 = vld [vmem:[#allocation2 + $0x158] sm:$0xff]  ;;  %v133_v28 = vld [vmem:[#allocation2 + $0x240] sm:$0xff]  ;;  %v1429_v30 = vpack.c.bf16 %v99_v22, %v95_v21  ;;  %v142_v32 = vld [vmem:[#allocation2 + $0x288] sm:$0xff]  ;;  %1428 = vmatprep.subr.bf16.mxu1 %v1427_v20 }
  0x4b   :  { %1366 = vmatpush1.bf16.msra.mxu0 %v1365_v31  ;;  %v108_v26 = vld [vmem:[#allocation2 + $0x178] sm:$0xff]  ;;  %v137_v29 = vld [vmem:[#allocation2 + $0x260] sm:$0xff]  ;;  %v1383_v31 = vpack.c.bf16 %v138_v24, %v134_v19  ;;  %v103_v34 = vld [vmem:[#allocation2 + $0x150] sm:$0xff] }
  0x4c   :  { %1368 = vmatprep.subr.bf16.mxu0 %v1367_v35  ;;  %286 = vmatprep.mubr.f32.mxu0 %v198_v23  ;;  %v1431_v33 = vpack.c.bf16 %v108_v26, %v104_v25  ;;  %v107_v35 = vld [vmem:[#allocation2 + $0x170] sm:$0xff]  ;;  %v146_v36 = vld [vmem:[#allocation2 + $0x2a8] sm:$0xff]  ;;  %v112_v37 = vld [vmem:[#allocation2 + $0x198] sm:$0xff]  ;;  %v1385_v39 = vpack.c.bf16 %v137_v29, %v133_v28 }
  0x4d   :  { %357 = vmatprep.mubr.f32.mxu1 %v198_v23  ;;  %v116_v38 = vld [vmem:[#allocation2 + $0x1b8] sm:$0xff]  ;;  %v141_v41 = vld [vmem:[#allocation2 + $0x280] sm:$0xff]  ;;  %1430 = vmatpush1.bf16.msra.mxu1 %v1429_v30  ;;  %v1433_v43 = vpack.c.bf16 %v107_v35, %v103_v34  ;;  %v1387_v44 = vpack.c.bf16 %v146_v36, %v142_v32  ;;  %v150_v45 = vld [vmem:[#allocation2 + $0x2c8] sm:$0xff] }
  0x4e   :  { %v145_v42 = vld [vmem:[#allocation2 + $0x2a0] sm:$0xff]  ;;  %1432 = vmatprep.subr.bf16.mxu1 %v1431_v33  ;;  %v1435_v46 = vpack.c.bf16 %v116_v38, %v112_v37  ;;  %v111_v47 = vld [vmem:[#allocation2 + $0x190] sm:$0xff]  ;;  %v154_v49 = vld [vmem:[#allocation2 + $0x2e8] sm:$0xff] }
  0x4f   :  { %1370 = vmatpush1.bf16.msra.mxu0 %v1369_v48  ;;  %v115_v48 = vld [vmem:[#allocation2 + $0x1b0] sm:$0xff]  ;;  %v120_v50 = vld [vmem:[#allocation2 + $0x1d8] sm:$0xff]  ;;  %v1389_v52 = vpack.c.bf16 %v145_v42, %v141_v41  ;;  %v153_v54 = vld [vmem:[#allocation2 + $0x2e0] sm:$0xff]  ;;  %v1391_v56 = vpack.c.bf16 %v154_v49, %v150_v45 }
  0x50   :  { %1372 = vmatprep.subr.bf16.mxu0 %v1371_v53  ;;  %v124_v51 = vld [vmem:[#allocation2 + $0x1f8] sm:$0xff]  ;;  %v149_v53 = vld [vmem:[#allocation2 + $0x2c0] sm:$0xff]  ;;  %v1437_v55 = vpack.c.bf16 %v115_v48, %v111_v47  ;;  %v158_v58 = vld [vmem:[#allocation2 + $0x308] sm:$0xff] }
  0x51   :  { %1434 = vmatpush1.bf16.msra.mxu1 %v1433_v43  ;;  %v1439_v59 = vpack.c.bf16 %v124_v51, %v120_v50  ;;  %v119_v60 = vld [vmem:[#allocation2 + $0x1d0] sm:$0xff]  ;;  %v128_v63 = vld [vmem:[#allocation2 + $0x218] sm:$0xff]  ;;  %v1393_v1 = vpack.c.bf16 %v153_v54, %v149_v53  ;;  %v157_v2 = vld [vmem:[#allocation2 + $0x300] sm:$0xff] }
  0x52   :  { %1436 = vmatprep.subr.bf16.mxu1 %v1435_v46  ;;  %v123_v61 = vld [vmem:[#allocation2 + $0x1f0] sm:$0xff]  ;;  %v132_v0 = vld [vmem:[#allocation2 + $0x238] sm:$0xff]  ;;  %v166_v6 = vld [vmem:[#allocation2 + $0x348] sm:$0xff] }
  0x53   :  { %1374 = vmatpush1.bf16.msra.mxu0 %v1373_v62  ;;  %v162_v62 = vld [vmem:[#allocation2 + $0x328] sm:$0xff]  ;;  %v1441_v4 = vpack.c.bf16 %v123_v61, %v119_v60  ;;  %v1443_v7 = vpack.c.bf16 %v132_v0, %v128_v63  ;;  %v127_v9 = vld [vmem:[#allocation2 + $0x210] sm:$0xff]  ;;  %v136_v12 = vld [vmem:[#allocation2 + $0x258] sm:$0xff] }
  0x54   :  { %1376 = vmatprep.subr.bf16.mxu0 %v1375_v3  ;;  %v161_v3 = vld [vmem:[#allocation2 + $0x320] sm:$0xff]  ;;  %v1395_v5 = vpack.c.bf16 %v162_v62, %v158_v58  ;;  %v131_v10 = vld [vmem:[#allocation2 + $0x230] sm:$0xff]  ;;  %v170_v11 = vld [vmem:[#allocation2 + $0x368] sm:$0xff] }
  0x55   :  { %1438 = vmatpush1.bf16.msra.mxu1 %v1437_v55  ;;  %v1397_v14 = vpack.c.bf16 %v161_v3, %v157_v2  ;;  %v165_v15 = vld [vmem:[#allocation2 + $0x340] sm:$0xff]  ;;  %v1399_v19 = vpack.c.bf16 %v170_v11, %v166_v6  ;;  %v174_v20 = vld [vmem:[#allocation2 + $0x388] sm:$0xff]  ;;  %v135_v22 = vld [vmem:[#allocation2 + $0x250] sm:$0xff] }
  0x56   :  { %1440 = vmatprep.subr.bf16.mxu1 %v1439_v59  ;;  %v169_v16 = vld [vmem:[#allocation2 + $0x360] sm:$0xff]  ;;  %v139_v23 = vld [vmem:[#allocation2 + $0x270] sm:$0xff]  ;;  %v178_v24 = vld [vmem:[#allocation2 + $0x3a8] sm:$0xff] }
  0x57   :  { %1378 = vmatpush1.bf16.msra.mxu0 %v1377_v13  ;;  %v140_v13 = vld [vmem:[#allocation2 + $0x278] sm:$0xff]  ;;  %v173_v28 = vld [vmem:[#allocation2 + $0x380] sm:$0xff]  ;;  %v1449_v30 = vpack.c.bf16 %v139_v23, %v135_v22  ;;  %v182_v32 = vld [vmem:[#allocation2 + $0x3c8] sm:$0xff] }
  0x58   :  { %1380 = vmatprep.subr.bf16.mxu0 %v1379_v18  ;;  %v1445_v18 = vpack.c.bf16 %v131_v10, %v127_v9  ;;  %v1447_v21 = vpack.c.bf16 %v140_v13, %v136_v12  ;;  %v144_v25 = vld [vmem:[#allocation2 + $0x298] sm:$0xff]  ;;  %v177_v29 = vld [vmem:[#allocation2 + $0x3a0] sm:$0xff]  ;;  %v143_v34 = vld [vmem:[#allocation2 + $0x290] sm:$0xff] }
  0x59   :  { %1442 = vmatpush1.bf16.msra.mxu1 %v1441_v4  ;;  %v148_v26 = vld [vmem:[#allocation2 + $0x2b8] sm:$0xff]  ;;  %v147_v35 = vld [vmem:[#allocation2 + $0x2b0] sm:$0xff]  ;;  %v186_v36 = vld [vmem:[#allocation2 + $0x3e8] sm:$0xff] }
  0x5a   :  { %1444 = vmatprep.subr.bf16.mxu1 %v1443_v7  ;;  %v1451_v33 = vpack.c.bf16 %v148_v26, %v144_v25  ;;  %v152_v37 = vld [vmem:[#allocation2 + $0x2d8] sm:$0xff]  ;;  %v181_v41 = vld [vmem:[#allocation2 + $0x3c0] sm:$0xff]  ;;  %v1453_v43 = vpack.c.bf16 %v147_v35, %v143_v34  ;;  %v151_v46 = vld [vmem:[#allocation2 + $0x2d0] sm:$0xff] }
  0x5b   :  { %1382 = vmatpush1.bf16.msra.mxu0 %v1381_v27  ;;  %v1401_v27 = vpack.c.bf16 %v169_v16, %v165_v15  ;;  %v156_v38 = vld [vmem:[#allocation2 + $0x2f8] sm:$0xff]  ;;  %v185_v42 = vld [vmem:[#allocation2 + $0x3e0] sm:$0xff]  ;;  %v155_v47 = vld [vmem:[#allocation2 + $0x2f0] sm:$0xff] }
  0x5c   :  { %1384 = vmatprep.subr.bf16.mxu0 %v1383_v31  ;;  %v1403_v31 = vpack.c.bf16 %v178_v24, %v174_v20  ;;  %v1455_v45 = vpack.c.bf16 %v156_v38, %v152_v37  ;;  %v160_v48 = vld [vmem:[#allocation2 + $0x318] sm:$0xff]  ;;  %v389_v50 = vld [vmem:[#allocation4 + $0x8] sm:$0xff]  ;;  %v1409_v53 = vpack.c.bf16 %v185_v42, %v181_v41  ;;  %v1457_v54 = vpack.c.bf16 %v155_v47, %v151_v46  ;;  %v159_v55 = vld [vmem:[#allocation2 + $0x310] sm:$0xff] }
  0x5d   :  { %1446 = vmatpush1.bf16.msra.mxu1 %v1445_v18  ;;  %v164_v49 = vld [vmem:[#allocation2 + $0x338] sm:$0xff]  ;;  %v388_v61 = vld [vmem:[#allocation4] sm:$0xff]  ;;  %v390_v62 = vld [vmem:[#allocation4 + $0x10] sm:$0xff] }
  0x5e   :  { %1448 = vmatprep.subr.bf16.mxu1 %v1447_v21  ;;  %v391_v51 = vld [vmem:[#allocation4 + $0x18] sm:$0xff]  ;;  %v1459_v58 = vpack.c.bf16 %v164_v49, %v160_v48  ;;  %v393_v0 = vld [vmem:[#allocation4 + $0x28] sm:$0xff]  ;;  %v167_v4 = vld [vmem:[#allocation2 + $0x350] sm:$0xff]  ;;  %v1477_v6 = vpack.c.bf16 %v390_v62, %v388_v61 }
  0x5f   :  { %1386 = vmatpush1.bf16.msra.mxu0 %v1385_v39  ;;  %v1405_v39 = vpack.c.bf16 %v177_v29, %v173_v28  ;;  %v168_v59 = vld [vmem:[#allocation2 + $0x358] sm:$0xff]  ;;  %v1475_v60 = vpack.c.bf16 %v391_v51, %v389_v50  ;;  %v392_v11 = vld [vmem:[#allocation4 + $0x20] sm:$0xff]  ;;  %v394_v12 = vld [vmem:[#allocation4 + $0x30] sm:$0xff] }
  0x60   :  { %1388 = vmatprep.subr.bf16.mxu0 %v1387_v44  ;;  %v1407_v44 = vpack.c.bf16 %v186_v36, %v182_v32  ;;  %v172_v63 = vld [vmem:[#allocation2 + $0x378] sm:$0xff]  ;;  %v175_v16 = vld [vmem:[#allocation2 + $0x390] sm:$0xff]  ;;  %v396_v23 = vld [vmem:[#allocation4 + $0x40] sm:$0xff] }
  0x61   :  { %1450 = vmatpush1.bf16.msra.mxu1 %v1449_v30  ;;  %v1463_v7 = vpack.c.bf16 %v172_v63, %v168_v59  ;;  %v176_v9 = vld [vmem:[#allocation2 + $0x398] sm:$0xff]  ;;  %v179_v18 = vld [vmem:[#allocation2 + $0x3b0] sm:$0xff]  ;;  %v401_v26 = vld [vmem:[#allocation4 + $0x68] sm:$0xff] }
  0x62   :  { %1452 = vmatprep.subr.bf16.mxu1 %v1451_v33  ;;  %v180_v13 = vld [vmem:[#allocation2 + $0x3b8] sm:$0xff]  ;;  %v398_v24 = vld [vmem:[#allocation4 + $0x50] sm:$0xff]  ;;  %v1469_v28 = vpack.c.bf16 %v179_v18, %v175_v16  ;;  %v400_v34 = vld [vmem:[#allocation4 + $0x60] sm:$0xff] }
  0x63   :  { %1390 = vmatpush1.bf16.msra.mxu0 %v1389_v52  ;;  %v1992_v52 = vsub.s32 0, %v1979_v57  ;;  %v399_v15 = vld [vmem:[#allocation4 + $0x58] sm:$0xff]  ;;  %v1467_v20 = vpack.c.bf16 %v180_v13, %v176_v9  ;;  %v183_v29 = vld [vmem:[#allocation2 + $0x3d0] sm:$0xff]  ;;  %v1485_v30 = vpack.c.bf16 %v398_v24, %v396_v23  ;;  %v405_v36 = vld [vmem:[#allocation4 + $0x88] sm:$0xff] }
  0x64   :  { %1392 = vmatprep.subr.bf16.mxu0 %v1391_v56  ;;  %v163_v56 = vld [vmem:[#allocation2 + $0x330] sm:$0xff]  ;;  %v184_v21 = vld [vmem:[#allocation2 + $0x3d8] sm:$0xff]  ;;  %v404_v42 = vld [vmem:[#allocation4 + $0x80] sm:$0xff] }
  0x65   :  { %1454 = vmatpush1.bf16.msra.mxu1 %v1453_v43  ;;  %v1996_v2 = vrot.slane %v1987_v17, %v1992_v52  ;;  %v1461_v3 = vpack.c.bf16 %v163_v56, %v159_v55  ;;  %v188_v25 = vld [vmem:[#allocation2 + $0x3f8] sm:$0xff]  ;;  %v187_v32 = vld [vmem:[#allocation2 + $0x3f0] sm:$0xff]  ;;  %v408_v48 = vld [vmem:[#allocation4 + $0xa0] sm:$0xff] }
  0x66   :  { %1456 = vmatprep.subr.bf16.mxu1 %v1455_v45  ;;  %v402_v35 = vld [vmem:[#allocation4 + $0x70] sm:$0xff]  ;;  %v407_v37 = vld [vmem:[#allocation4 + $0x98] sm:$0xff]  ;;  %v1473_v38 = vpack.c.bf16 %v187_v32, %v183_v29  ;;  %v413_v50 = vld [vmem:[#allocation4 + $0xc8] sm:$0xff] }
  0x67   :  { %1394 = vmatpush1.bf16.msra.mxu0 %v1393_v1  ;;  %v395_v1 = vld [vmem:[#allocation4 + $0x38] sm:$0xff]  ;;  %v1491_v41 = vpack.c.bf16 %v407_v37, %v405_v36  ;;  %v406_v43 = vld [vmem:[#allocation4 + $0x90] sm:$0xff]  ;;  %v412_v55 = vld [vmem:[#allocation4 + $0xc0] sm:$0xff] }
  0x68   :  { %1396 = vmatprep.subr.bf16.mxu0 %v1395_v5  ;;  %v171_v5 = vld [vmem:[#allocation2 + $0x370] sm:$0xff]  ;;  %v1479_v10 = vpack.c.bf16 %v395_v1, %v393_v0  ;;  %v411_v45 = vld [vmem:[#allocation4 + $0xb8] sm:$0xff]  ;;  %v1493_v46 = vpack.c.bf16 %v406_v43, %v404_v42  ;;  %v416_v62 = vld [vmem:[#allocation4 + $0xe0] sm:$0xff] }
  0x69   :  { %1458 = vmatpush1.bf16.msra.mxu1 %v1457_v54  ;;  %v1465_v17 = vpack.c.bf16 %v171_v5, %v167_v4  ;;  %v410_v49 = vld [vmem:[#allocation4 + $0xb0] sm:$0xff]  ;;  %v415_v51 = vld [vmem:[#allocation4 + $0xd8] sm:$0xff]  ;;  %v421_v0 = vld [vmem:[#allocation4 + $0x108] sm:$0xff] }
  0x6a   :  { %1460 = vmatprep.subr.bf16.mxu1 %v1459_v58  ;;  %v1499_v54 = vpack.c.bf16 %v415_v51, %v413_v50  ;;  %v414_v56 = vld [vmem:[#allocation4 + $0xd0] sm:$0xff]  ;;  %v417_v58 = vld [vmem:[#allocation4 + $0xe8] sm:$0xff]  ;;  %v419_v59 = vld [vmem:[#allocation4 + $0xf8] sm:$0xff] }
  0x6b   :  { %1398 = vmatpush1.bf16.msra.mxu0 %v1397_v14  ;;  %v397_v14 = vld [vmem:[#allocation4 + $0x48] sm:$0xff]  ;;  %v1503_v61 = vpack.c.bf16 %v419_v59, %v417_v58  ;;  %v418_v63 = vld [vmem:[#allocation4 + $0xf0] sm:$0xff]  ;;  %v423_v1 = vld [vmem:[#allocation4 + $0x118] sm:$0xff] }
  0x6c   :  { %1400 = vmatprep.subr.bf16.mxu0 %v1399_v19  ;;  %v1481_v19 = vpack.c.bf16 %v394_v12, %v392_v11  ;;  %v1483_v22 = vpack.c.bf16 %v399_v15, %v397_v14  ;;  %v420_v4 = vld [vmem:[#allocation4 + $0x100] sm:$0xff]  ;;  %v422_v5 = vld [vmem:[#allocation4 + $0x110] sm:$0xff]  ;;  %v429_v13 = vld [vmem:[#allocation4 + $0x148] sm:$0xff] }
  0x6d   :  { %1462 = vmatpush1.bf16.msra.mxu1 %v1461_v3  ;;  %v1505_v3 = vpack.c.bf16 %v418_v63, %v416_v62  ;;  %v1509_v9 = vpack.c.bf16 %v422_v5, %v420_v4  ;;  %v424_v11 = vld [vmem:[#allocation4 + $0x120] sm:$0xff]  ;;  %v426_v12 = vld [vmem:[#allocation4 + $0x130] sm:$0xff]  ;;  %v431_v14 = vld [vmem:[#allocation4 + $0x158] sm:$0xff] }
  0x6e   :  { %1464 = vmatprep.subr.bf16.mxu1 %v1463_v7  ;;  %v427_v7 = vld [vmem:[#allocation4 + $0x138] sm:$0xff]  ;;  %v1513_v15 = vpack.c.bf16 %v426_v12, %v424_v11  ;;  %v428_v16 = vld [vmem:[#allocation4 + $0x140] sm:$0xff]  ;;  %v430_v18 = vld [vmem:[#allocation4 + $0x150] sm:$0xff] }
  0x6f   :  { %1402 = vmatpush1.bf16.msra.mxu0 %v1401_v27  ;;  %v403_v27 = vld [vmem:[#allocation4 + $0x78] sm:$0xff]  ;;  %v432_v23 = vld [vmem:[#allocation4 + $0x160] sm:$0xff]  ;;  %v434_v24 = vld [vmem:[#allocation4 + $0x170] sm:$0xff] }
  0x70   :  { %1404 = vmatprep.subr.bf16.mxu0 %v1403_v31  ;;  %v1471_v31 = vpack.c.bf16 %v188_v25, %v184_v21  ;;  %v1487_v33 = vpack.c.bf16 %v403_v27, %v401_v26  ;;  %v435_v21 = vld [vmem:[#allocation4 + $0x178] sm:$0xff]  ;;  %v1521_v25 = vpack.c.bf16 %v434_v24, %v432_v23  ;;  %v437_v26 = vld [vmem:[#allocation4 + $0x188] sm:$0xff]  ;;  %v436_v29 = vld [vmem:[#allocation4 + $0x180] sm:$0xff] }
  0x71   :  { %1466 = vmatpush1.bf16.msra.mxu1 %v1465_v17  ;;  %v1515_v17 = vpack.c.bf16 %v431_v14, %v429_v13  ;;  %v439_v27 = vld [vmem:[#allocation4 + $0x198] sm:$0xff]  ;;  %v441_v32 = vld [vmem:[#allocation4 + $0x1a8] sm:$0xff]  ;;  %v442_v36 = vld [vmem:[#allocation4 + $0x1b0] sm:$0xff] }
  0x72   :  { %1468 = vmatprep.subr.bf16.mxu1 %v1467_v20  ;;  %v433_v20 = vld [vmem:[#allocation4 + $0x168] sm:$0xff]  ;;  %v446_v42 = vld [vmem:[#allocation4 + $0x1d0] sm:$0xff]  ;;  %v683_v58 = vld [vmem:[#allocation4 + $0x400] sm:$0xff] }
  0x73   :  { %1406 = vmatpush1.bf16.msra.mxu0 %v1405_v39  ;;  %v1489_v39 = vpack.c.bf16 %v402_v35, %v400_v34  ;;  %v440_v35 = vld [vmem:[#allocation4 + $0x1a0] sm:$0xff]  ;;  %v445_v37 = vld [vmem:[#allocation4 + $0x1c8] sm:$0xff]  ;;  %v702_v62 = vld [vmem:[#allocation4 + $0x530] sm:$0xff] }
  0x74   :  { %1408 = vmatprep.subr.bf16.mxu0 %v1407_v44  ;;  %v409_v44 = vld [vmem:[#allocation4 + $0xa8] sm:$0xff]  ;;  %v704_v4 = vld [vmem:[#allocation4 + $0x550] sm:$0xff]  ;;  %v452_v23 = vld [vmem:[#allocation4 + $0x200] sm:$0xff] }
  0x75   :  { %1470 = vmatpush1.bf16.msra.mxu1 %v1469_v28  ;;  %v1495_v47 = vpack.c.bf16 %v411_v45, %v409_v44  ;;  %v1523_v28 = vpack.c.bf16 %v439_v27, %v437_v26  ;;  %v449_v44 = vld [vmem:[#allocation4 + $0x1e8] sm:$0xff]  ;;  %v451_v45 = vld [vmem:[#allocation4 + $0x1f8] sm:$0xff]  ;;  %v454_v24 = vld [vmem:[#allocation4 + $0x210] sm:$0xff] }
  0x76   :  { %1472 = vmatprep.subr.bf16.mxu1 %v1471_v31  ;;  %v453_v51 = vld [vmem:[#allocation4 + $0x208] sm:$0xff] }
  0x77   :  { %1410 = vmatpush1.bf16.msra.mxu0 %v1409_v53  ;;  %v1497_v53 = vpack.c.bf16 %v410_v49, %v408_v48  ;;  %v448_v48 = vld [vmem:[#allocation4 + $0x1e0] sm:$0xff]  ;;  %v450_v49 = vld [vmem:[#allocation4 + $0x1f0] sm:$0xff] }
  0x78   :  { %1476 = vmatprep.subr.bf16.mxu0 %v1475_v60  ;;  %v1501_v60 = vpack.c.bf16 %v414_v56, %v412_v55  ;;  %v1537_v50 = vpack.c.bf16 %v450_v49, %v448_v48  ;;  %v699_v55 = vld [vmem:[#allocation4 + $0x500] sm:$0xff]  ;;  %v700_v56 = vld [vmem:[#allocation4 + $0x510] sm:$0xff]  ;;  %v467_v48 = vld [vmem:[#allocation4 + $0x278] sm:$0xff] }
  0x79   :  { %1474 = vmatpush1.bf16.msra.mxu1 %v1473_v38  ;;  %v1529_v38 = vpack.c.bf16 %v442_v36, %v440_v35  ;;  %v1603_v59 = vpack.c.bf16 %v700_v56, %v699_v55  ;;  %v456_v36 = vld [vmem:[#allocation4 + $0x220] sm:$0xff]  ;;  %v471_v55 = vld [vmem:[#allocation4 + $0x298] sm:$0xff] }
  0x7a   :  { %287 = vmatmul.mubr.f32.vlgmr.msra.gmra.mrb[0].mxu0 %v1996_v2 }
  0x7b   :  { %1478 = vmatpush1.bf16.msra.mxu0 %v1477_v6  ;;  %v425_v6 = vld [vmem:[#allocation4 + $0x128] sm:$0xff]  ;;  %1604 = vmatprep.subr.bf16.mxu1 %v1603_v59  ;;  %v468_v59 = vld [vmem:[#allocation4 + $0x280] sm:$0xff] }
  0x7c   :  { %1480 = vmatprep.subr.bf16.mxu0 %v1479_v10  ;;  %358 = vmatmul.mubr.f32.vlgmr.msra.gmra.mrb[0].mxu1 %v1996_v2  ;;  %v1507_v2 = vpack.c.bf16 %v423_v1, %v421_v0  ;;  %v1511_v10 = vpack.c.bf16 %v427_v7, %v425_v6  ;;  %v685_v1 = vld [vmem:[#allocation4 + $0x420] sm:$0xff] }
  0x7d   :  { %v2000_v7 = vld [vmem:[#allocation6] ss:$8 sm:$0xf] }
  0x7f   :  { %1482 = vmatpush1.bf16.msra.mxu0 %v1481_v19  ;;  %v1517_v19 = vpack.c.bf16 %v430_v18, %v428_v16 }
  0x80   :  { %1484 = vmatprep.subr.bf16.mxu0 %v1483_v22  ;;  %v1519_v22 = vpack.c.bf16 %v435_v21, %v433_v20 }
  0x83   :  { %1486 = vmatpush1.bf16.msra.mxu0 %v1485_v30  ;;  %v438_v30 = vld [vmem:[#allocation4 + $0x190] sm:$0xff] }
  0x84   :  { %1488 = vmatprep.subr.bf16.mxu0 %v1487_v33  ;;  %v1525_v31 = vpack.c.bf16 %v438_v30, %v436_v29  ;;  %v443_v33 = vld [vmem:[#allocation4 + $0x1b8] sm:$0xff] }
  0x85   :  { %v1527_v34 = vpack.c.bf16 %v443_v33, %v441_v32  ;;  %v459_v29 = vld [vmem:[#allocation4 + $0x238] sm:$0xff]  ;;  %v1541_v32 = vpack.c.bf16 %v454_v24, %v452_v23 }
  0x86   :  { %v487_v23 = vld [vmem:[#allocation4 + $0x318] sm:$0xff] }
  0x87   :  { %1490 = vmatpush1.bf16.msra.mxu0 %v1489_v39  ;;  %v447_v39 = vld [vmem:[#allocation4 + $0x1d8] sm:$0xff] }
  0x88   :  { %1492 = vmatprep.subr.bf16.mxu0 %v1491_v41  ;;  %v444_v41 = vld [vmem:[#allocation4 + $0x1c0] sm:$0xff]  ;;  %v1531_v43 = vpack.c.bf16 %v447_v39, %v445_v37  ;;  %v458_v37 = vld [vmem:[#allocation4 + $0x230] sm:$0xff]  ;;  %v461_v39 = vld [vmem:[#allocation4 + $0x248] sm:$0xff] }
  0x8b   :  { %1494 = vmatpush1.bf16.msra.mxu0 %v1493_v46  ;;  %v1533_v46 = vpack.c.bf16 %v446_v42, %v444_v41  ;;  %v463_v41 = vld [vmem:[#allocation4 + $0x258] sm:$0xff] }
  0x8c   :  { %1496 = vmatprep.subr.bf16.mxu0 %v1495_v47  ;;  %v1535_v47 = vpack.c.bf16 %v451_v45, %v449_v44  ;;  %v1547_v44 = vpack.c.bf16 %v463_v41, %v461_v39  ;;  %v460_v45 = vld [vmem:[#allocation4 + $0x240] sm:$0xff] }
  0x8f   :  { %1498 = vmatpush1.bf16.msra.mxu0 %v1497_v53  ;;  %v455_v53 = vld [vmem:[#allocation4 + $0x218] sm:$0xff] }
  0x90   :  { %1500 = vmatprep.subr.bf16.mxu0 %v1499_v54  ;;  %v1539_v54 = vpack.c.bf16 %v455_v53, %v453_v51  ;;  %v464_v51 = vld [vmem:[#allocation4 + $0x260] sm:$0xff]  ;;  %v466_v53 = vld [vmem:[#allocation4 + $0x270] sm:$0xff] }
  0x91   :  { %v1553_v56 = vpack.c.bf16 %v466_v53, %v464_v51  ;;  %v503_v51 = vld [vmem:[#allocation4 + $0x398] sm:$0xff] }
  0x93   :  { %1502 = vmatpush1.bf16.msra.mxu0 %v1501_v60  ;;  %v684_v60 = vld [vmem:[#allocation4 + $0x410] sm:$0xff] }
  0x94   :  { %1504 = vmatprep.subr.bf16.mxu0 %v1503_v61  ;;  %v701_v61 = vld [vmem:[#allocation4 + $0x520] sm:$0xff]  ;;  %v1605_v63 = vpack.c.bf16 %v684_v60, %v683_v58  ;;  %v470_v60 = vld [vmem:[#allocation4 + $0x290] sm:$0xff] }
  0x95   :  { %v1607_v0 = vpack.c.bf16 %v702_v62, %v701_v61  ;;  %v473_v62 = vld [vmem:[#allocation4 + $0x2a8] sm:$0xff] }
  0x96   :  { %1606 = vmatpush3.bf16.msra.mxu1 %v1605_v63  ;;  %v475_v63 = vld [vmem:[#allocation4 + $0x2b8] sm:$0xff] }
  0x97   :  { %1506 = vmatpush1.bf16.msra.mxu0 %v1505_v3  ;;  %v686_v3 = vld [vmem:[#allocation4 + $0x430] sm:$0xff]  ;;  %1608 = vmatprep.subr.bf16.mxu1 %v1607_v0 }
  0x98   :  { %1508 = vmatprep.subr.bf16.mxu0 %v1507_v2  ;;  %v703_v2 = vld [vmem:[#allocation4 + $0x540] sm:$0xff]  ;;  %v1609_v5 = vpack.c.bf16 %v686_v3, %v685_v1  ;;  %v1557_v1 = vpack.c.bf16 %v470_v60, %v468_v59  ;;  %v1559_v3 = vpack.c.bf16 %v475_v63, %v473_v62  ;;  %v507_v59 = vld [vmem:[#allocation4 + $0x3b8] sm:$0xff]  ;;  %v506_v63 = vld [vmem:[#allocation4 + $0x3b0] sm:$0xff] }
  0x99   :  { %v1611_v6 = vpack.c.bf16 %v704_v4, %v703_v2  ;;  %v472_v2 = vld [vmem:[#allocation4 + $0x2a0] sm:$0xff]  ;;  %v474_v4 = vld [vmem:[#allocation4 + $0x2b0] sm:$0xff] }
  0x9a   :  { %1610 = vmatpush3.bf16.msra.mxu1 %v1609_v5  ;;  %v504_v62 = vld [vmem:[#allocation4 + $0x3a0] sm:$0xff] }
  0x9b   :  { %1510 = vmatpush1.bf16.msra.mxu0 %v1509_v9  ;;  %1612 = vmatprep.subr.bf16.mxu1 %v1611_v6  ;;  %v205_v9 = vrot.slane %v2000_v7, %v1992_v52  ;;  %v477_v6 = vld [vmem:[#allocation4 + $0x2c8] sm:$0xff] }
  0x9c   :  { %1512 = vmatprep.subr.bf16.mxu0 %v1511_v10  ;;  %v209_v10 = vrot.slane %v2000_v7, %v1982_v8 }
  0x9f   :  { %1514 = vmatpush1.bf16.msra.mxu0 %v1513_v15 }
  0xa0   :  { %1516 = vmatprep.subr.bf16.mxu0 %v1515_v17 }
  0xa3   :  { %1518 = vmatpush1.bf16.msra.mxu0 %v1517_v19  ;;  %v216_v19 = vsub.s32 3, %v1979_v57 }
  0xa4   :  { %1520 = vmatprep.subr.bf16.mxu0 %v1519_v22 }
  0xa5   :  { %v217_v20 = vrot.slane %v2000_v7, %v216_v19 }
  0xa7   :  { %1522 = vmatpush1.bf16.msra.mxu0 %v1521_v25 }
  0xa8   :  { %1524 = vmatprep.subr.bf16.mxu0 %v1523_v28  ;;  %v457_v28 = vld [vmem:[#allocation4 + $0x228] sm:$0xff] }
  0xa9   :  { %v1543_v35 = vpack.c.bf16 %v459_v29, %v457_v28  ;;  %v486_v28 = vld [vmem:[#allocation4 + $0x310] sm:$0xff]  ;;  %v489_v29 = vld [vmem:[#allocation4 + $0x328] sm:$0xff] }
  0xab   :  { %1526 = vmatpush1.bf16.msra.mxu0 %v1525_v31 }
  0xac   :  { %1528 = vmatprep.subr.bf16.mxu0 %v1527_v34 }
  0xaf   :  { %1530 = vmatpush1.bf16.msra.mxu0 %v1529_v38 }
  0xb0   :  { %1532 = vmatprep.subr.bf16.mxu0 %v1531_v43  ;;  %v1545_v43 = vpack.c.bf16 %v458_v37, %v456_v36  ;;  %v493_v36 = vld [vmem:[#allocation4 + $0x348] sm:$0xff]  ;;  %v495_v37 = vld [vmem:[#allocation4 + $0x358] sm:$0xff] }
  0xb1   :  { %v1579_v41 = vpack.c.bf16 %v495_v37, %v493_v36  ;;  %v709_v36 = vld [vmem:[#allocation4 + $0x5a0] sm:$0xff]  ;;  %v710_v37 = vld [vmem:[#allocation4 + $0x5b0] sm:$0xff] }
  0xb3   :  { %1534 = vmatpush1.bf16.msra.mxu0 %v1533_v46  ;;  %v462_v46 = vld [vmem:[#allocation4 + $0x250] sm:$0xff] }
  0xb4   :  { %1536 = vmatprep.subr.bf16.mxu0 %v1535_v47  ;;  %v465_v47 = vld [vmem:[#allocation4 + $0x268] sm:$0xff]  ;;  %v1549_v49 = vpack.c.bf16 %v462_v46, %v460_v45  ;;  %v499_v45 = vld [vmem:[#allocation4 + $0x378] sm:$0xff] }
  0xb7   :  { %1538 = vmatpush1.bf16.msra.mxu0 %v1537_v50  ;;  %v1551_v50 = vpack.c.bf16 %v467_v48, %v465_v47  ;;  %v496_v48 = vld [vmem:[#allocation4 + $0x360] sm:$0xff] }
  0xb8   :  { %1540 = vmatprep.subr.bf16.mxu0 %v1539_v54  ;;  %v469_v54 = vld [vmem:[#allocation4 + $0x288] sm:$0xff] }
  0xb9   :  { %v1555_v58 = vpack.c.bf16 %v471_v55, %v469_v54  ;;  %v500_v55 = vld [vmem:[#allocation4 + $0x380] sm:$0xff] }
 0x14d   :  { %v288_v11 = vpop.f32.mrb[0].mxu0 }
 0x14e   :  { %v289_v12 = vadd.f32 %v288_v11, %v205_v9  ;;  %v290_v13 = vpop.f32.mrb[1].mxu0  ;;  %v479_v9 = vld [vmem:[#allocation4 + $0x2d8] sm:$0xff] }
 0x14f   :  { %v291_v14 = vadd.f32 %v290_v13, %v209_v10  ;;  %v2010_v21 = vpop.f32.mrb[0].mxu1  ;;  %v1561_v10 = vpack.c.bf16 %v474_v4, %v472_v2  ;;  %v1563_v11 = vpack.c.bf16 %v479_v9, %v477_v6  ;;  %v478_v13 = vld [vmem:[#allocation4 + $0x2d0] sm:$0xff]  ;;  %v508_v4 = vld [vmem:[#allocation4 + $0x3c0] sm:$0xff]  ;;  %v513_v6 = vld [vmem:[#allocation4 + $0x3e8] sm:$0xff] }
 0x150   :  { %v368_v15 = vmin.f32 %v289_v12, 0.0  ;;  %v361_v25 = vpop.f32.mrb[1].mxu1  ;;  %vm364_vm1 = vcmp.gt.f32.partialorder %v289_v12, 0.0  ;;  %v515_v9 = vld [vmem:[#allocation4 + $0x3f8] sm:$0xff] }
 0x151   :  { %v369_v17 = vmin.f32 %v291_v14, 0.0  ;;  %v362_v30 = vadd.f32 %v361_v25, %v217_v20  ;;  %vm365_vm0 = vcmp.gt.f32.partialorder %v291_v14, 0.0  ;;  %v482_v20 = vld [vmem:[#allocation4 + $0x2f0] sm:$0xff]  ;;  %v212_v25 = vsub.s32 2, %v1979_v57 }
 0x152   :  { %v372_v16 = vmul.f32 1.442695, %v368_v15  ;;  %v483_v15 = vld [vmem:[#allocation4 + $0x2f8] sm:$0xff] }
 0x153   :  { %v374_v18 = vmul.f32 1.442695, %v369_v17  ;;  %v371_v33 = vmin.f32 %v362_v30, 0.0  ;;  %vm367_vm2 = vcmp.gt.f32.partialorder %v362_v30, 0.0 }
 0x154   :  { %1802 = vpow2.f32 %v372_v16 }
 0x155   :  { %1804 = vpow2.f32 %v374_v18  ;;  %v378_v42 = vmul.f32 1.442695, %v371_v33  ;;  %v480_v18 = vld [vmem:[#allocation4 + $0x2e0] sm:$0xff] }
 0x156   :  { %v1569_v24 = vpack.c.bf16 %v482_v20, %v480_v18  ;;  %v687_v18 = vld [vmem:[#allocation4 + $0x440] sm:$0xff]  ;;  %v688_v20 = vld [vmem:[#allocation4 + $0x450] sm:$0xff] }
 0x157   :  { %1806 = vpow2.f32 %v378_v42  ;;  %v492_v42 = vld [vmem:[#allocation4 + $0x340] sm:$0xff] }
 0x15e   :  { %v1803_v22 = vpop.eup %1802 }
 0x15f   :  { %v1805_v26 = vpop.eup %1804  ;;  %v1250_v27 = vadd.f32 -1.0, %v1803_v22  ;;  %v485_v22 = vld [vmem:[#allocation4 + $0x308] sm:$0xff] }
 0x160   :  { %v1251_v31 = vadd.f32 -1.0, %v1805_v26  ;;  %v1571_v26 = vpack.c.bf16 %v487_v23, %v485_v22  ;;  %v1613_v22 = vpack.c.bf16 %v688_v20, %v687_v18  ;;  %v705_v23 = vld [vmem:[#allocation4 + $0x560] sm:$0xff] }
 0x161   :  { %v384_v38 = vsel %vm364_vm1, %v289_v12, %v1250_v27  ;;  %v1807_v61 = vpop.eup %1806  ;;  %v476_v12 = vld [vmem:[#allocation4 + $0x2c0] sm:$0xff] }
 0x162   :  { %v385_v34 = vsel %vm365_vm0, %v291_v14, %v1251_v31  ;;  %v1253_v0 = vadd.f32 -1.0, %v1807_v61  ;;  %v481_v14 = vld [vmem:[#allocation4 + $0x2e8] sm:$0xff]  ;;  %v1565_v17 = vpack.c.bf16 %v478_v13, %v476_v12  ;;  %v484_v27 = vld [vmem:[#allocation4 + $0x300] sm:$0xff]  ;;  %v514_v13 = vld [vmem:[#allocation4 + $0x3f0] sm:$0xff]  ;;  %1614 = vmatpush3.bf16.msra.mxu1 %v1613_v22 }
 0x163   :  { %593 = vmatprep.mubr.f32.mxu0 %v385_v34  ;;  %v1567_v16 = vpack.c.bf16 %v483_v15, %v481_v14  ;;  %v1573_v31 = vpack.c.bf16 %v486_v28, %v484_v27  ;;  %v488_v34 = vld [vmem:[#allocation4 + $0x320] sm:$0xff]  ;;  %v690_v28 = vld [vmem:[#allocation4 + $0x470] sm:$0xff] }
 0x164   :  { %594 = vmatmul.mubr.f32.vlgmr.msra.gmra.mrb[2].mxu0 %v384_v38  ;;  %v387_v5 = vsel %vm367_vm2, %v362_v30, %v1253_v0  ;;  %v491_v30 = vld [vmem:[#allocation4 + $0x338] sm:$0xff]  ;;  %v509_v0 = vld [vmem:[#allocation4 + $0x3c8] sm:$0xff]  ;;  %v512_v12 = vld [vmem:[#allocation4 + $0x3e0] sm:$0xff] }
 0x165   :  { %1542 = vmatpush1.bf16.msra.mxu0 %v1541_v32  ;;  %664 = vmatprep.mubr.f32.mxu0 %v387_v5  ;;  %v213_v32 = vrot.slane %v2000_v7, %v212_v25  ;;  %v1575_v33 = vpack.c.bf16 %v491_v30, %v489_v29  ;;  %v510_v5 = vld [vmem:[#allocation4 + $0x3d0] sm:$0xff]  ;;  %v1601_v15 = vpack.c.bf16 %v514_v13, %v512_v12  ;;  %v689_v27 = vld [vmem:[#allocation4 + $0x460] sm:$0xff]  ;;  %v801_v12 = vld [vmem:[#allocation2 + $0x448] sm:$0xff] }
 0x166   :  { %1544 = vmatprep.subr.bf16.mxu0 %v1543_v35  ;;  %v490_v35 = vld [vmem:[#allocation4 + $0x330] sm:$0xff]  ;;  %v1617_v29 = vpack.c.bf16 %v690_v28, %v689_v27  ;;  %v707_v30 = vld [vmem:[#allocation4 + $0x580] sm:$0xff]  ;;  %v805_v13 = vld [vmem:[#allocation2 + $0x468] sm:$0xff] }
 0x167   :  { %v1577_v38 = vpack.c.bf16 %v490_v35, %v488_v34  ;;  %v360_v39 = vadd.f32 %v2010_v21, %v213_v32  ;;  %v692_v34 = vld [vmem:[#allocation4 + $0x490] sm:$0xff]  ;;  %v800_v18 = vld [vmem:[#allocation2 + $0x440] sm:$0xff] }
 0x168   :  { %v804_v20 = vld [vmem:[#allocation2 + $0x460] sm:$0xff] }
 0x169   :  { %1546 = vmatpush1.bf16.msra.mxu0 %v1545_v43  ;;  %v494_v43 = vld [vmem:[#allocation4 + $0x350] sm:$0xff]  ;;  %v370_v47 = vmin.f32 %v360_v39, 0.0  ;;  %vm366_vm3 = vcmp.gt.f32.partialorder %v360_v39, 0.0  ;;  %v808_v28 = vld [vmem:[#allocation2 + $0x480] sm:$0xff] }
 0x16a   :  { %1548 = vmatprep.subr.bf16.mxu0 %v1547_v44  ;;  %v497_v44 = vld [vmem:[#allocation4 + $0x368] sm:$0xff]  ;;  %v1581_v46 = vpack.c.bf16 %v494_v43, %v492_v42  ;;  %v711_v42 = vld [vmem:[#allocation4 + $0x5c0] sm:$0xff]  ;;  %v712_v43 = vld [vmem:[#allocation4 + $0x5d0] sm:$0xff] }
 0x16b   :  { %v1583_v7 = vpack.c.bf16 %v499_v45, %v497_v44  ;;  %v376_v54 = vmul.f32 1.442695, %v370_v47  ;;  %v1627_v45 = vpack.c.bf16 %v712_v43, %v711_v42  ;;  %v696_v47 = vld [vmem:[#allocation4 + $0x4d0] sm:$0xff]  ;;  %v828_v42 = vld [vmem:[#allocation2 + $0x520] sm:$0xff]  ;;  %v833_v43 = vld [vmem:[#allocation2 + $0x548] sm:$0xff] }
 0x16d   :  { %1550 = vmatpush1.bf16.msra.mxu0 %v1549_v49  ;;  %v498_v49 = vld [vmem:[#allocation4 + $0x370] sm:$0xff]  ;;  %1808 = vpow2.f32 %v376_v54 }
 0x16e   :  { %1552 = vmatprep.subr.bf16.mxu0 %v1551_v50  ;;  %v501_v50 = vld [vmem:[#allocation4 + $0x388] sm:$0xff]  ;;  %v1585_v53 = vpack.c.bf16 %v498_v49, %v496_v48  ;;  %v714_v48 = vld [vmem:[#allocation4 + $0x5f0] sm:$0xff] }
 0x16f   :  { %v1587_v21 = vpack.c.bf16 %v503_v51, %v501_v50  ;;  %v697_v51 = vld [vmem:[#allocation4 + $0x4e0] sm:$0xff] }
 0x171   :  { %1554 = vmatpush1.bf16.msra.mxu0 %v1553_v56  ;;  %v502_v56 = vld [vmem:[#allocation4 + $0x390] sm:$0xff] }
 0x172   :  { %1556 = vmatprep.subr.bf16.mxu0 %v1555_v58  ;;  %v505_v58 = vld [vmem:[#allocation4 + $0x3a8] sm:$0xff]  ;;  %v1589_v60 = vpack.c.bf16 %v502_v56, %v500_v55 }
 0x173   :  { %v1591_v61 = vpack.c.bf16 %v507_v59, %v505_v58  ;;  %v797_v55 = vld [vmem:[#allocation2 + $0x428] sm:$0xff] }
 0x174   :  { %v517_v58 = vld [vmem:[#allocation6 + $0x20] ss:$8 sm:$0x3] }
 0x175   :  { %1558 = vmatpush1.bf16.msra.mxu0 %v1557_v1  ;;  %v511_v1 = vld [vmem:[#allocation4 + $0x3d8] sm:$0xff]  ;;  %v522_v59 = vrot.slane %v517_v58, %v1992_v52 }
 0x176   :  { %1560 = vmatprep.subr.bf16.mxu0 %v1559_v3  ;;  %v1593_v3 = vpack.c.bf16 %v506_v63, %v504_v62  ;;  %v1595_v2 = vpack.c.bf16 %v511_v1, %v509_v0 }
 0x177   :  { %v1809_v14 = vpop.eup %1808 }
 0x179   :  { %1562 = vmatpush1.bf16.msra.mxu0 %v1561_v10  ;;  %v1597_v10 = vpack.c.bf16 %v510_v5, %v508_v4 }
 0x17a   :  { %1564 = vmatprep.subr.bf16.mxu0 %v1563_v11  ;;  %v1599_v11 = vpack.c.bf16 %v515_v9, %v513_v6  ;;  %v792_v6 = vld [vmem:[#allocation2 + $0x400] sm:$0xff] }
 0x17b   :  { %v796_v9 = vld [vmem:[#allocation2 + $0x420] sm:$0xff] }
 0x17d   :  { %1566 = vmatpush1.bf16.msra.mxu0 %v1565_v17  ;;  %v1252_v17 = vadd.f32 -1.0, %v1809_v14 }
 0x17e   :  { %1568 = vmatprep.subr.bf16.mxu0 %v1567_v16 }
 0x17f   :  { %v386_v16 = vsel %vm366_vm3, %v360_v39, %v1252_v17  ;;  %v1623_v39 = vpack.c.bf16 %v710_v37, %v709_v36  ;;  %v825_v36 = vld [vmem:[#allocation2 + $0x508] sm:$0xff] }
 0x180   :  { %v829_v37 = vld [vmem:[#allocation2 + $0x528] sm:$0xff] }
 0x181   :  { %1570 = vmatpush1.bf16.msra.mxu0 %v1569_v24  ;;  %v706_v24 = vld [vmem:[#allocation4 + $0x570] sm:$0xff] }
 0x182   :  { %1572 = vmatprep.subr.bf16.mxu0 %v1571_v26  ;;  %v1615_v26 = vpack.c.bf16 %v706_v24, %v705_v23  ;;  %v809_v23 = vld [vmem:[#allocation2 + $0x488] sm:$0xff] }
 0x183   :  { %v813_v24 = vld [vmem:[#allocation2 + $0x4a8] sm:$0xff] }
 0x184   :  { %1616 = vmatprep.subr.bf16.mxu1 %v1615_v26  ;;  %v1641_v26 = vpack.c.bf16 %v804_v20, %v800_v18  ;;  %v1643_v27 = vpack.c.bf16 %v813_v24, %v809_v23  ;;  %v881_v18 = vld [vmem:[#allocation2 + $0x6c8] sm:$0xff]  ;;  %v880_v23 = vld [vmem:[#allocation2 + $0x6c0] sm:$0xff] }
 0x185   :  { %1574 = vmatpush1.bf16.msra.mxu0 %v1573_v31  ;;  %1618 = vmatpush3.bf16.msra.mxu1 %v1617_v29  ;;  %v708_v31 = vld [vmem:[#allocation4 + $0x590] sm:$0xff]  ;;  %v812_v29 = vld [vmem:[#allocation2 + $0x4a0] sm:$0xff]  ;;  %v885_v20 = vld [vmem:[#allocation2 + $0x6e8] sm:$0xff] }
 0x186   :  { %1576 = vmatprep.subr.bf16.mxu0 %v1575_v33  ;;  %v1619_v32 = vpack.c.bf16 %v708_v31, %v707_v30  ;;  %v691_v33 = vld [vmem:[#allocation4 + $0x480] sm:$0xff]  ;;  %v817_v30 = vld [vmem:[#allocation2 + $0x4c8] sm:$0xff] }
 0x187   :  { %v1621_v35 = vpack.c.bf16 %v692_v34, %v691_v33  ;;  %v821_v31 = vld [vmem:[#allocation2 + $0x4e8] sm:$0xff]  ;;  %v816_v34 = vld [vmem:[#allocation2 + $0x4c0] sm:$0xff] }
 0x188   :  { %1620 = vmatprep.subr.bf16.mxu1 %v1619_v32  ;;  %v1645_v32 = vpack.c.bf16 %v812_v29, %v808_v28  ;;  %v1647_v33 = vpack.c.bf16 %v821_v31, %v817_v30  ;;  %v884_v24 = vld [vmem:[#allocation2 + $0x6e0] sm:$0xff]  ;;  %v893_v28 = vld [vmem:[#allocation2 + $0x728] sm:$0xff] }
 0x189   :  { %1578 = vmatpush1.bf16.msra.mxu0 %v1577_v38  ;;  %1622 = vmatpush3.bf16.msra.mxu1 %v1621_v35  ;;  %v693_v38 = vld [vmem:[#allocation4 + $0x4a0] sm:$0xff] }
 0x18a   :  { %1580 = vmatprep.subr.bf16.mxu0 %v1579_v41  ;;  %v694_v41 = vld [vmem:[#allocation4 + $0x4b0] sm:$0xff]  ;;  %1624 = vmatprep.subr.bf16.mxu1 %v1623_v39  ;;  %v820_v35 = vld [vmem:[#allocation2 + $0x4e0] sm:$0xff]  ;;  %v1651_v39 = vpack.c.bf16 %v829_v37, %v825_v36 }
 0x18b   :  { %v1625_v44 = vpack.c.bf16 %v694_v41, %v693_v38  ;;  %v1649_v38 = vpack.c.bf16 %v820_v35, %v816_v34  ;;  %v824_v41 = vld [vmem:[#allocation2 + $0x500] sm:$0xff]  ;;  %v901_v34 = vld [vmem:[#allocation2 + $0x768] sm:$0xff] }
 0x18c   :  { %v888_v30 = vld [vmem:[#allocation2 + $0x700] sm:$0xff] }
 0x18d   :  { %1582 = vmatpush1.bf16.msra.mxu0 %v1581_v46  ;;  %v695_v46 = vld [vmem:[#allocation4 + $0x4c0] sm:$0xff]  ;;  %1626 = vmatpush3.bf16.msra.mxu1 %v1625_v44  ;;  %v837_v44 = vld [vmem:[#allocation2 + $0x568] sm:$0xff] }
 0x18e   :  { %1584 = vmatprep.subr.bf16.mxu0 %v1583_v7  ;;  %v713_v7 = vld [vmem:[#allocation4 + $0x5e0] sm:$0xff]  ;;  %v1629_v49 = vpack.c.bf16 %v696_v47, %v695_v46  ;;  %1628 = vmatprep.subr.bf16.mxu1 %v1627_v45  ;;  %v1653_v45 = vpack.c.bf16 %v828_v42, %v824_v41  ;;  %v1655_v46 = vpack.c.bf16 %v837_v44, %v833_v43  ;;  %v909_v41 = vld [vmem:[#allocation2 + $0x7a8] sm:$0xff] }
 0x18f   :  { %v1631_v50 = vpack.c.bf16 %v714_v48, %v713_v7  ;;  %v832_v47 = vld [vmem:[#allocation2 + $0x540] sm:$0xff]  ;;  %v841_v48 = vld [vmem:[#allocation2 + $0x588] sm:$0xff] }
 0x190   :  { %v836_v7 = vld [vmem:[#allocation2 + $0x560] sm:$0xff] }
 0x191   :  { %1586 = vmatpush1.bf16.msra.mxu0 %v1585_v53  ;;  %v698_v53 = vld [vmem:[#allocation4 + $0x4f0] sm:$0xff]  ;;  %1630 = vmatpush3.bf16.msra.mxu1 %v1629_v49  ;;  %v845_v49 = vld [vmem:[#allocation2 + $0x5a8] sm:$0xff]  ;;  %v892_v31 = vld [vmem:[#allocation2 + $0x720] sm:$0xff] }
 0x192   :  { %1588 = vmatprep.subr.bf16.mxu0 %v1587_v21  ;;  %v1633_v54 = vpack.c.bf16 %v698_v53, %v697_v51  ;;  %1632 = vmatprep.subr.bf16.mxu1 %v1631_v50  ;;  %v793_v21 = vld [vmem:[#allocation2 + $0x408] sm:$0xff]  ;;  %v1657_v50 = vpack.c.bf16 %v836_v7, %v832_v47  ;;  %v1659_v51 = vpack.c.bf16 %v845_v49, %v841_v48  ;;  %v840_v53 = vld [vmem:[#allocation2 + $0x580] sm:$0xff] }
 0x193   :  { %v1635_v56 = vpack.c.bf16 %v797_v55, %v793_v21  ;;  %v849_v21 = vld [vmem:[#allocation2 + $0x5c8] sm:$0xff]  ;;  %v896_v36 = vld [vmem:[#allocation2 + $0x740] sm:$0xff] }
 0x194   :  { %v853_v55 = vld [vmem:[#allocation2 + $0x5e8] sm:$0xff]  ;;  %v900_v37 = vld [vmem:[#allocation2 + $0x760] sm:$0xff] }
 0x195   :  { %1590 = vmatpush1.bf16.msra.mxu0 %v1589_v60  ;;  %1634 = vmatpush3.bf16.msra.mxu1 %v1633_v54  ;;  %v526_v60 = vrot.slane %v517_v58, %v1982_v8  ;;  %v844_v54 = vld [vmem:[#allocation2 + $0x5a0] sm:$0xff]  ;;  %v1663_v58 = vpack.c.bf16 %v853_v55, %v849_v21 }
 0x196   :  { %1592 = vmatprep.subr.bf16.mxu0 %v1591_v61  ;;  %1636 = vmatprep.subr.bf16.mxu1 %v1635_v56  ;;  %v1661_v56 = vpack.c.bf16 %v844_v54, %v840_v53  ;;  %v904_v42 = vld [vmem:[#allocation2 + $0x780] sm:$0xff]  ;;  %v799_v53 = vld [vmem:[#allocation2 + $0x438] sm:$0xff] }
 0x197   :  { %v908_v44 = vld [vmem:[#allocation2 + $0x7a0] sm:$0xff] }
 0x198   :  { %v1693_v47 = vpack.c.bf16 %v908_v44, %v904_v42  ;;  %v59_v7 = vld [vmem:[%s2040_s0 + $0x2] sm:$0x1]  ;;  %v842_v44 = vld [vmem:[#allocation2 + $0x590] sm:$0xff] }
 0x199   :  { %1594 = vmatpush1.bf16.msra.mxu0 %v1593_v3  ;;  %v912_v49 = vld [vmem:[#allocation2 + $0x7c0] sm:$0xff] }
 0x19a   :  { %1596 = vmatprep.subr.bf16.mxu0 %v1595_v2 }
 0x19d   :  { %1598 = vmatpush1.bf16.msra.mxu0 %v1597_v10 }
 0x19e   :  { %1600 = vmatprep.subr.bf16.mxu0 %v1599_v11 }
 0x1a1   :  { %1602 = vmatpush1.bf16.msra.mxu0 %v1601_v15  ;;  %v1637_v15 = vpack.c.bf16 %v796_v9, %v792_v6  ;;  %v864_v9 = vld [vmem:[#allocation2 + $0x640] sm:$0xff] }
 0x1a4   :  { %665 = vmatmul.mubr.f32.vlgmr.msra.gmra.mrb[2].mxu0 %v386_v16  ;;  %v1639_v16 = vpack.c.bf16 %v805_v13, %v801_v12  ;;  %v877_v12 = vld [vmem:[#allocation2 + $0x6a8] sm:$0xff] }
 0x277   :  { %v666_v61 = vpop.f32.mrb[2].mxu0 }
 0x278   :  { %v1787_v62 = vadd.f32 %v666_v61, %v522_v59  ;;  %v668_v63 = vpop.f32.mrb[3].mxu0  ;;  %v848_v59 = vld [vmem:[#allocation2 + $0x5c0] sm:$0xff]  ;;  %v857_v61 = vld [vmem:[#allocation2 + $0x608] sm:$0xff] }
 0x279   :  { %v1788_v0 = vadd.f32 %v668_v63, %v526_v60  ;;  %v852_v60 = vld [vmem:[#allocation2 + $0x5e0] sm:$0xff] }
 0x27a   :  { %v673_v1 = vmin.f32 %v1787_v62, 0.0  ;;  %vm671_vm5 = vcmp.gt.f32.partialorder %v1787_v62, 0.0  ;;  %v1665_v63 = vpack.c.bf16 %v852_v60, %v848_v59 }
 0x27b   :  { %v674_v3 = vmin.f32 %v1788_v0, 0.0  ;;  %vm672_vm4 = vcmp.gt.f32.partialorder %v1788_v0, 0.0 }
 0x27c   :  { %v675_v2 = vmul.f32 1.442695, %v673_v1  ;;  %v856_v1 = vld [vmem:[#allocation2 + $0x600] sm:$0xff] }
 0x27d   :  { %v677_v4 = vmul.f32 1.442695, %v674_v3  ;;  %v860_v3 = vld [vmem:[#allocation2 + $0x620] sm:$0xff] }
 0x27e   :  { %1810 = vpow2.f32 %v675_v2  ;;  %v865_v2 = vld [vmem:[#allocation2 + $0x648] sm:$0xff] }
 0x27f   :  { %1812 = vpow2.f32 %v677_v4  ;;  %v869_v4 = vld [vmem:[#allocation2 + $0x668] sm:$0xff] }
 0x280   :  { %v1671_v6 = vpack.c.bf16 %v869_v4, %v865_v2 }
 0x288   :  { %v1811_v5 = vpop.eup %1810 }
 0x289   :  { %v1813_v10 = vpop.eup %1812  ;;  %v1254_v11 = vadd.f32 -1.0, %v1811_v5  ;;  %v1669_v5 = vpack.c.bf16 %v860_v3, %v856_v1  ;;  %v803_v1 = vld [vmem:[#allocation2 + $0x458] sm:$0xff] }
 0x28a   :  { %v1255_v14 = vadd.f32 -1.0, %v1813_v10  ;;  %v868_v10 = vld [vmem:[#allocation2 + $0x660] sm:$0xff]  ;;  %v807_v3 = vld [vmem:[#allocation2 + $0x478] sm:$0xff] }
 0x28b   :  { %v681_v22 = vsel %vm671_vm5, %v1787_v62, %v1254_v11  ;;  %v861_v62 = vld [vmem:[#allocation2 + $0x628] sm:$0xff]  ;;  %v1673_v13 = vpack.c.bf16 %v868_v10, %v864_v9  ;;  %v802_v9 = vld [vmem:[#allocation2 + $0x450] sm:$0xff] }
 0x28c   :  { %v682_v17 = vsel %vm672_vm4, %v1788_v0, %v1255_v14  ;;  %v1667_v0 = vpack.c.bf16 %v861_v62, %v857_v61  ;;  %v873_v11 = vld [vmem:[#allocation2 + $0x688] sm:$0xff]  ;;  %v806_v10 = vld [vmem:[#allocation2 + $0x470] sm:$0xff] }
 0x28d   :  { %780 = vmatprep.mubr.f32.mxu1 %v682_v17  ;;  %v1675_v14 = vpack.c.bf16 %v877_v12, %v873_v11  ;;  %v876_v17 = vld [vmem:[#allocation2 + $0x6a0] sm:$0xff]  ;;  %v811_v12 = vld [vmem:[#allocation2 + $0x498] sm:$0xff] }
 0x28e   :  { %781 = vmatmul.mubr.f32.vlgmr.msra.gmra.mrb[2].mxu1 %v681_v22  ;;  %v1679_v22 = vpack.c.bf16 %v885_v20, %v881_v18  ;;  %v819_v18 = vld [vmem:[#allocation2 + $0x4d8] sm:$0xff] }
 0x28f   :  { %1638 = vmatpush1.bf16.msra.mxu1 %v1637_v15  ;;  %v872_v15 = vld [vmem:[#allocation2 + $0x680] sm:$0xff]  ;;  %1007 = vmatprep.mubr.f32.mxu1 %v59_v7  ;;  %v823_v20 = vld [vmem:[#allocation2 + $0x4f8] sm:$0xff] }
 0x290   :  { %1640 = vmatprep.subr.bf16.mxu1 %v1639_v16  ;;  %v1677_v16 = vpack.c.bf16 %v876_v17, %v872_v15  ;;  %v810_v17 = vld [vmem:[#allocation2 + $0x490] sm:$0xff] }
 0x293   :  { %1642 = vmatpush1.bf16.msra.mxu1 %v1641_v26  ;;  %v1681_v26 = vpack.c.bf16 %v884_v24, %v880_v23  ;;  %v1711_v23 = vpack.c.bf16 %v823_v20, %v819_v18  ;;  %v818_v24 = vld [vmem:[#allocation2 + $0x4d0] sm:$0xff] }
 0x294   :  { %1644 = vmatprep.subr.bf16.mxu1 %v1643_v27  ;;  %v889_v27 = vld [vmem:[#allocation2 + $0x708] sm:$0xff]  ;;  %v890_v20 = vld [vmem:[#allocation2 + $0x710] sm:$0xff] }
 0x295   :  { %v1683_v29 = vpack.c.bf16 %v893_v28, %v889_v27  ;;  %v827_v27 = vld [vmem:[#allocation2 + $0x518] sm:$0xff] }
 0x296   :  { %v831_v28 = vld [vmem:[#allocation2 + $0x538] sm:$0xff] }
 0x297   :  { %1646 = vmatpush1.bf16.msra.mxu1 %v1645_v32  ;;  %v1685_v32 = vpack.c.bf16 %v892_v31, %v888_v30  ;;  %v1715_v30 = vpack.c.bf16 %v831_v28, %v827_v27  ;;  %v826_v31 = vld [vmem:[#allocation2 + $0x510] sm:$0xff] }
 0x298   :  { %1648 = vmatprep.subr.bf16.mxu1 %v1647_v33  ;;  %v897_v33 = vld [vmem:[#allocation2 + $0x748] sm:$0xff]  ;;  %v898_v28 = vld [vmem:[#allocation2 + $0x750] sm:$0xff] }
 0x299   :  { %v1687_v35 = vpack.c.bf16 %v901_v34, %v897_v33  ;;  %v835_v33 = vld [vmem:[#allocation2 + $0x558] sm:$0xff] }
 0x29a   :  { %v839_v34 = vld [vmem:[#allocation2 + $0x578] sm:$0xff] }
 0x29b   :  { %1650 = vmatpush1.bf16.msra.mxu1 %v1649_v38  ;;  %v1689_v38 = vpack.c.bf16 %v900_v37, %v896_v36  ;;  %v1719_v36 = vpack.c.bf16 %v839_v34, %v835_v33  ;;  %v834_v37 = vld [vmem:[#allocation2 + $0x550] sm:$0xff] }
 0x29c   :  { %1652 = vmatprep.subr.bf16.mxu1 %v1651_v39  ;;  %v905_v39 = vld [vmem:[#allocation2 + $0x788] sm:$0xff]  ;;  %v906_v34 = vld [vmem:[#allocation2 + $0x790] sm:$0xff] }
 0x29d   :  { %v1691_v43 = vpack.c.bf16 %v909_v41, %v905_v39  ;;  %v843_v39 = vld [vmem:[#allocation2 + $0x598] sm:$0xff] }
 0x29e   :  { %v847_v41 = vld [vmem:[#allocation2 + $0x5b8] sm:$0xff] }
 0x29f   :  { %1654 = vmatpush1.bf16.msra.mxu1 %v1653_v45  ;;  %v913_v45 = vld [vmem:[#allocation2 + $0x7c8] sm:$0xff] }
 0x2a0   :  { %1656 = vmatprep.subr.bf16.mxu1 %v1655_v46  ;;  %v917_v46 = vld [vmem:[#allocation2 + $0x7e8] sm:$0xff] }
 0x2a1   :  { %v1695_v48 = vpack.c.bf16 %v917_v46, %v913_v45  ;;  %v846_v45 = vld [vmem:[#allocation2 + $0x5b0] sm:$0xff]  ;;  %v851_v46 = vld [vmem:[#allocation2 + $0x5d8] sm:$0xff] }
 0x2a3   :  { %1658 = vmatpush1.bf16.msra.mxu1 %v1657_v50  ;;  %v916_v50 = vld [vmem:[#allocation2 + $0x7e0] sm:$0xff] }
 0x2a4   :  { %1660 = vmatprep.subr.bf16.mxu1 %v1659_v51  ;;  %v795_v51 = vld [vmem:[#allocation2 + $0x418] sm:$0xff]  ;;  %v1697_v54 = vpack.c.bf16 %v916_v50, %v912_v49  ;;  %v850_v49 = vld [vmem:[#allocation2 + $0x5d0] sm:$0xff] }
 0x2a5   :  { %v1699_v21 = vpack.c.bf16 %v799_v53, %v795_v51  ;;  %v854_v50 = vld [vmem:[#allocation2 + $0x5f0] sm:$0xff]  ;;  %v859_v51 = vld [vmem:[#allocation2 + $0x618] sm:$0xff] }
 0x2a6   :  { %v863_v53 = vld [vmem:[#allocation2 + $0x638] sm:$0xff] }
 0x2a7   :  { %1662 = vmatpush1.bf16.msra.mxu1 %v1661_v56  ;;  %v715_v56 = vld [vmem:[#allocation6 + $0x40] ss:$0 sm:$0xff] }
 0x2a8   :  { %1664 = vmatprep.subr.bf16.mxu1 %v1663_v58 }
 0x2ab   :  { %1666 = vmatpush1.bf16.msra.mxu1 %v1665_v63  ;;  %v794_v63 = vld [vmem:[#allocation2 + $0x410] sm:$0xff] }
 0x2ac   :  { %1668 = vmatprep.subr.bf16.mxu1 %v1667_v0  ;;  %v798_v0 = vld [vmem:[#allocation2 + $0x430] sm:$0xff] }
 0x2af   :  { %1670 = vmatpush1.bf16.msra.mxu1 %v1669_v5  ;;  %v1701_v5 = vpack.c.bf16 %v798_v0, %v794_v63  ;;  %v870_v63 = vld [vmem:[#allocation2 + $0x670] sm:$0xff]  ;;  %v875_v0 = vld [vmem:[#allocation2 + $0x698] sm:$0xff] }
 0x2b0   :  { %1672 = vmatprep.subr.bf16.mxu1 %v1671_v6  ;;  %v1703_v6 = vpack.c.bf16 %v807_v3, %v803_v1  ;;  %v879_v1 = vld [vmem:[#allocation2 + $0x6b8] sm:$0xff] }
 0x2b3   :  { %1674 = vmatpush1.bf16.msra.mxu1 %v1673_v13  ;;  %v815_v13 = vld [vmem:[#allocation2 + $0x4b8] sm:$0xff] }
 0x2b4   :  { %1676 = vmatprep.subr.bf16.mxu1 %v1675_v14  ;;  %v1705_v14 = vpack.c.bf16 %v806_v10, %v802_v9  ;;  %v1707_v15 = vpack.c.bf16 %v815_v13, %v811_v12  ;;  %v887_v9 = vld [vmem:[#allocation2 + $0x6f8] sm:$0xff]  ;;  %v882_v13 = vld [vmem:[#allocation2 + $0x6d0] sm:$0xff] }
 0x2b7   :  { %1678 = vmatpush1.bf16.msra.mxu1 %v1677_v16  ;;  %v814_v16 = vld [vmem:[#allocation2 + $0x4b0] sm:$0xff] }
 0x2b8   :  { %1680 = vmatprep.subr.bf16.mxu1 %v1679_v22  ;;  %v1709_v22 = vpack.c.bf16 %v814_v16, %v810_v17  ;;  %v895_v17 = vld [vmem:[#allocation2 + $0x738] sm:$0xff] }
 0x2bb   :  { %1682 = vmatpush1.bf16.msra.mxu1 %v1681_v26  ;;  %v822_v26 = vld [vmem:[#allocation2 + $0x4f0] sm:$0xff] }
 0x2bc   :  { %1684 = vmatprep.subr.bf16.mxu1 %v1683_v29  ;;  %v1713_v29 = vpack.c.bf16 %v822_v26, %v818_v24  ;;  %v903_v24 = vld [vmem:[#allocation2 + $0x778] sm:$0xff] }
 0x2bf   :  { %1686 = vmatpush1.bf16.msra.mxu1 %v1685_v32  ;;  %v830_v32 = vld [vmem:[#allocation2 + $0x530] sm:$0xff] }
 0x2c0   :  { %1688 = vmatprep.subr.bf16.mxu1 %v1687_v35  ;;  %v1717_v35 = vpack.c.bf16 %v830_v32, %v826_v31  ;;  %v911_v31 = vld [vmem:[#allocation2 + $0x7b8] sm:$0xff] }
 0x2c3   :  { %1690 = vmatpush1.bf16.msra.mxu1 %v1689_v38  ;;  %v838_v38 = vld [vmem:[#allocation2 + $0x570] sm:$0xff] }
 0x2c4   :  { %1692 = vmatprep.subr.bf16.mxu1 %v1691_v43  ;;  %v1721_v42 = vpack.c.bf16 %v838_v38, %v834_v37  ;;  %v1723_v43 = vpack.c.bf16 %v847_v41, %v843_v39  ;;  %v919_v37 = vld [vmem:[#allocation2 + $0x7f8] sm:$0xff]  ;;  %v914_v41 = vld [vmem:[#allocation2 + $0x7d0] sm:$0xff] }
 0x2c7   :  { %1694 = vmatpush1.bf16.msra.mxu1 %v1693_v47  ;;  %v855_v47 = vld [vmem:[#allocation2 + $0x5f8] sm:$0xff] }
 0x2c8   :  { %1696 = vmatprep.subr.bf16.mxu1 %v1695_v48  ;;  %v1727_v48 = vpack.c.bf16 %v855_v47, %v851_v46  ;;  %v1913_v47 = vmov 0.0|0.0  }
 0x2c9   :  { %1763 = vmatprep.subr.bf16.mxu0 %v1913_v47 }
 0x2cb   :  { %1698 = vmatpush1.bf16.msra.mxu1 %v1697_v54  ;;  %v1729_v54 = vpack.c.bf16 %v854_v50, %v850_v49  ;;  %v1113_v50 = vld [vmem:[#allocation4 + $0x448] sm:$0xff] }
 0x2cc   :  { %1700 = vmatprep.subr.bf16.mxu1 %v1699_v21  ;;  %v1731_v21 = vpack.c.bf16 %v863_v53, %v859_v51  ;;  %v1114_v51 = vld [vmem:[#allocation4 + $0x458] sm:$0xff] }
 0x2cd   :  { %v1770_v53 = vpack.c.bf16 %v1114_v51, %v1113_v50  ;;  %v1916_v51 = vmov 1966171168  }
 0x361   :  { %v1292_v55 = vpop.f32.mrb[2].mxu1 }
 0x362   :  { %v1293_v58 = vpop.f32.mrb[3].mxu1 }
 0x363   :  { %v1294_v59 = vadd.f32 %v1293_v58, %v1292_v55  ;;  %v858_v55 = vld [vmem:[#allocation2 + $0x610] sm:$0xff]  ;;  %v867_v58 = vld [vmem:[#allocation2 + $0x658] sm:$0xff] }
 0x365   :  { %v783_v60 = vadd.f32 %v1294_v59, %v715_v56  ;;  %v862_v56 = vld [vmem:[#allocation2 + $0x630] sm:$0xff]  ;;  %v871_v59 = vld [vmem:[#allocation2 + $0x678] sm:$0xff] }
 0x367   :  { %v787_v61 = vmin.f32 %v783_v60, 0.0  ;;  %vm786_vm6 = vcmp.gt.f32.partialorder %v783_v60, 0.0 }
 0x369   :  { %v788_v62 = vmul.f32 1.442695, %v787_v61  ;;  %v1735_v61 = vpack.c.bf16 %v871_v59, %v867_v58  ;;  %v1119_v59 = vld [vmem:[#allocation4 + $0x4a8] sm:$0xff] }
 0x36b   :  { %1814 = vpow2.f32 %v788_v62  ;;  %v866_v62 = vld [vmem:[#allocation2 + $0x650] sm:$0xff] }
 0x36c   :  { %v1737_v3 = vpack.c.bf16 %v870_v63, %v866_v62  ;;  %v1121_v62 = vld [vmem:[#allocation4 + $0x4c8] sm:$0xff]  ;;  %v1122_v63 = vld [vmem:[#allocation4 + $0x4d8] sm:$0xff] }
 0x375   :  { %v1815_v2 = vpop.eup %1814 }
 0x376   :  { %v1256_v4 = vadd.f32 -1.0, %v1815_v2  ;;  %v1739_v2 = vpack.c.bf16 %v879_v1, %v875_v0  ;;  %v1915_v0 = vmov 0.0   ;;  %v1782_v1 = vpack.c.bf16 %v1122_v63, %v1121_v62 }
 0x377   :  { %1344 = vmatprep.mubr.msk.f32.mxu0 %vm1914_vm7, %v1915_v0 }
 0x378   :  { %v2022_v11 = vsel %vm786_vm6, %v783_v60, %v1256_v4  ;;  %v1733_v60 = vpack.c.bf16 %v862_v56, %v858_v55  ;;  %v874_v4 = vld [vmem:[#allocation2 + $0x690] sm:$0xff]  ;;  %v1117_v55 = vld [vmem:[#allocation4 + $0x488] sm:$0xff]  ;;  %v1118_v56 = vld [vmem:[#allocation4 + $0x498] sm:$0xff] }
 0x379   :  { %1008 = vmatmul.mubr.f32.vlgmr.msra.gmra.mrb[4].mxu1 %v2022_v11  ;;  %v1776_v58 = vpack.c.bf16 %v1118_v56, %v1117_v55 }
 0x37a   :  { %1702 = vmatpush1.bf16.msra.mxu1 %v1701_v5  ;;  %1078 = vmatprep.mubr.f32.mxu1 %v59_v7  ;;  %v1725_v7 = vpack.c.bf16 %v846_v45, %v842_v44  ;;  %v878_v5 = vld [vmem:[#allocation2 + $0x6b0] sm:$0xff]  ;;  %v1109_v44 = vld [vmem:[#allocation4 + $0x408] sm:$0xff]  ;;  %v1110_v45 = vld [vmem:[#allocation4 + $0x418] sm:$0xff] }
 0x37b   :  { %1704 = vmatprep.subr.bf16.mxu1 %v1703_v6  ;;  %v883_v6 = vld [vmem:[#allocation2 + $0x6d8] sm:$0xff]  ;;  %v1741_v10 = vpack.c.bf16 %v878_v5, %v874_v4  ;;  %v1764_v46 = vpack.c.bf16 %v1110_v45, %v1109_v44 }
 0x37c   :  { %v1743_v12 = vpack.c.bf16 %v887_v9, %v883_v6  ;;  %v921_v9 = vld [vmem:[#allocation6 + $0x60] ss:$8 sm:$0xf] }
 0x37d   :  { %1765 = vmatpush3.bf16.msra.mxu0 %v1764_v46 }
 0x37e   :  { %1706 = vmatpush1.bf16.msra.mxu1 %v1705_v14  ;;  %v886_v14 = vld [vmem:[#allocation2 + $0x6f0] sm:$0xff]  ;;  %1766 = vmatprep.subr.bf16.mxu0 %v1913_v47 }
 0x37f   :  { %1708 = vmatprep.subr.bf16.mxu1 %v1707_v15  ;;  %v891_v15 = vld [vmem:[#allocation2 + $0x718] sm:$0xff]  ;;  %v1745_v16 = vpack.c.bf16 %v886_v14, %v882_v13 }
 0x380   :  { %v1747_v18 = vpack.c.bf16 %v895_v17, %v891_v15 }
 0x382   :  { %1710 = vmatpush1.bf16.msra.mxu1 %v1709_v22  ;;  %v894_v22 = vld [vmem:[#allocation2 + $0x730] sm:$0xff] }
 0x383   :  { %1712 = vmatprep.subr.bf16.mxu1 %v1711_v23  ;;  %v899_v23 = vld [vmem:[#allocation2 + $0x758] sm:$0xff]  ;;  %v1749_v26 = vpack.c.bf16 %v894_v22, %v890_v20  ;;  %v934_v22 = vrot.slane %v921_v9, %v212_v25 }
 0x384   :  { %v1751_v27 = vpack.c.bf16 %v903_v24, %v899_v23  ;;  %v938_v24 = vrot.slane %v921_v9, %v216_v19 }
 0x386   :  { %1714 = vmatpush1.bf16.msra.mxu1 %v1713_v29  ;;  %v902_v29 = vld [vmem:[#allocation2 + $0x770] sm:$0xff] }
 0x387   :  { %1716 = vmatprep.subr.bf16.mxu1 %v1715_v30  ;;  %v907_v30 = vld [vmem:[#allocation2 + $0x798] sm:$0xff]  ;;  %v1753_v32 = vpack.c.bf16 %v902_v29, %v898_v28 }
 0x388   :  { %v1755_v33 = vpack.c.bf16 %v911_v31, %v907_v30  ;;  %v60_v30 = vld [vmem:[%s2040_s0 + $0x3] sm:$0x1] }
 0x38a   :  { %1718 = vmatpush1.bf16.msra.mxu1 %v1717_v35  ;;  %v910_v35 = vld [vmem:[#allocation2 + $0x7b0] sm:$0xff] }
 0x38b   :  { %1720 = vmatprep.subr.bf16.mxu1 %v1719_v36  ;;  %v915_v36 = vld [vmem:[#allocation2 + $0x7d8] sm:$0xff]  ;;  %v1757_v38 = vpack.c.bf16 %v910_v35, %v906_v34 }
 0x38c   :  { %v1759_v39 = vpack.c.bf16 %v919_v37, %v915_v36 }
 0x38e   :  { %1722 = vmatpush1.bf16.msra.mxu1 %v1721_v42  ;;  %v918_v42 = vld [vmem:[#allocation2 + $0x7f0] sm:$0xff] }
 0x38f   :  { %1724 = vmatprep.subr.bf16.mxu1 %v1723_v43  ;;  %v1761_v43 = vpack.c.bf16 %v918_v42, %v914_v41  ;;  %v1125_v41 = vld [vmem:[#allocation6 + $0x80] ss:$0 sm:$0xff] }
 0x392   :  { %1726 = vmatpush1.bf16.msra.mxu1 %v1725_v7  ;;  %v1111_v7 = vld [vmem:[#allocation4 + $0x428] sm:$0xff] }
 0x393   :  { %1728 = vmatprep.subr.bf16.mxu1 %v1727_v48  ;;  %v1112_v48 = vld [vmem:[#allocation4 + $0x438] sm:$0xff] }
 0x394   :  { %v1767_v49 = vpack.c.bf16 %v1112_v48, %v1111_v7 }
 0x396   :  { %1730 = vmatpush1.bf16.msra.mxu1 %v1729_v54  ;;  %1768 = vmatpush3.bf16.msra.mxu0 %v1767_v49  ;;  %v1115_v54 = vld [vmem:[#allocation4 + $0x468] sm:$0xff] }
 0x397   :  { %1732 = vmatprep.subr.bf16.mxu1 %v1731_v21  ;;  %1769 = vmatprep.subr.bf16.mxu0 %v1913_v47  ;;  %v1116_v21 = vld [vmem:[#allocation4 + $0x478] sm:$0xff] }
 0x39a   :  { %1734 = vmatpush1.bf16.msra.mxu1 %v1733_v60  ;;  %1771 = vmatpush3.bf16.msra.mxu0 %v1770_v53  ;;  %v1120_v60 = vld [vmem:[#allocation4 + $0x4b8] sm:$0xff]  ;;  %v1217_v53 = vunpack.c.l.s4 %v1916_v51 }
 0x39b   :  { %1736 = vmatprep.subr.bf16.mxu1 %v1735_v61  ;;  %1772 = vmatprep.subr.bf16.mxu0 %v1913_v47  ;;  %v1779_v61 = vpack.c.bf16 %v1120_v60, %v1119_v59 }
 0x39e   :  { %1738 = vmatpush1.bf16.msra.mxu1 %v1737_v3  ;;  %v1123_v3 = vld [vmem:[#allocation4 + $0x4e8] sm:$0xff] }
 0x39f   :  { %1740 = vmatprep.subr.bf16.mxu1 %v1739_v2  ;;  %v1124_v2 = vld [vmem:[#allocation4 + $0x4f8] sm:$0xff] }
 0x3a0   :  { %v1785_v4 = vpack.c.bf16 %v1124_v2, %v1123_v3 }
 0x3a2   :  { %1742 = vmatpush1.bf16.msra.mxu1 %v1741_v10  ;;  %v930_v10 = vrot.slane %v921_v9, %v1982_v8 }
 0x3a3   :  { %1744 = vmatprep.subr.bf16.mxu1 %v1743_v12  ;;  %v926_v12 = vrot.slane %v921_v9, %v1992_v52 }
 0x3a6   :  { %1746 = vmatpush1.bf16.msra.mxu1 %v1745_v16 }
 0x3a7   :  { %1748 = vmatprep.subr.bf16.mxu1 %v1747_v18 }
 0x3aa   :  { %1750 = vmatpush1.bf16.msra.mxu1 %v1749_v26 }
 0x3ab   :  { %1752 = vmatprep.subr.bf16.mxu1 %v1751_v27 }
 0x3ae   :  { %1754 = vmatpush1.bf16.msra.mxu1 %v1753_v32 }
 0x3af   :  { %1756 = vmatprep.subr.bf16.mxu1 %v1755_v33 }
 0x3b2   :  { %1758 = vmatpush1.bf16.msra.mxu1 %v1757_v38 }
 0x3b3   :  { %1760 = vmatprep.subr.bf16.mxu1 %v1759_v39 }
 0x3b6   :  { %1762 = vmatpush1.bf16.msra.mxu1 %v1761_v43 }
 0x3b9   :  { %1079 = vmatmul.mubr.f32.vlgmr.msra.gmra.mrb[6].mxu1 %v2022_v11  ;;  %v1773_v11 = vpack.c.bf16 %v1116_v21, %v1115_v54  ;;  %v1218_v54 = vunpack.c.0.s8 %v1217_v53 }
 0x3bb   :  { %1774 = vmatpush3.bf16.msra.mxu0 %v1773_v11  ;;  %v1221_v11 = vsub.s32 %v1218_v54, %v1979_v57 }
 0x3bc   :  { %1775 = vmatprep.subr.bf16.mxu0 %v1913_v47 }
 0x3bf   :  { %1777 = vmatpush3.bf16.msra.mxu0 %v1776_v58 }
 0x3c0   :  { %1778 = vmatprep.subr.bf16.mxu0 %v1913_v47 }
 0x3c3   :  { %1780 = vmatpush3.bf16.msra.mxu0 %v1779_v61 }
 0x3c4   :  { %1781 = vmatprep.subr.bf16.mxu0 %v1913_v47 }
 0x3c7   :  { %1783 = vmatpush3.bf16.msra.mxu0 %v1782_v1 }
 0x3c8   :  { %1784 = vmatprep.subr.bf16.mxu0 %v1913_v47 }
 0x3cb   :  { %1786 = vmatpush3.bf16.msra.mxu0 %v1785_v4 }
 0x44c   :  { %v1009_v5 = vpop.f32.mrb[4].mxu1 }
 0x44d   :  { %v1011_v6 = vpop.f32.mrb[5].mxu1  ;;  %v1010_v14 = vadd.f32 %v1009_v5, %v926_v12 }
 0x44e   :  { %v1012_v13 = vadd.f32 %v1011_v6, %v930_v10 }
 0x44f   :  { %v1257_v17 = vmul.f32 -1.442695, %v1010_v14 }
 0x450   :  { %v1258_v15 = vmul.f32 -1.442695, %v1012_v13 }
 0x452   :  { %1816 = vpow2.f32 %v1258_v15 }
 0x453   :  { %1818 = vpow2.f32 %v1257_v17 }
 0x45c   :  { %v1817_v16 = vpop.eup %1816 }
 0x45d   :  { %v1819_v18 = vpop.eup %1818  ;;  %v1094_v20 = vadd.f32 1.0, %v1817_v16 }
 0x45e   :  { %v1088_v23 = vadd.f32 1.0, %v1819_v18 }
 0x45f   :  { %1820 = vrcp.f32 %v1094_v20 }
 0x460   :  { %1822 = vrcp.f32 %v1088_v23 }
 0x469   :  { %v1821_v29 = vpop.eup %1820 }
 0x46a   :  { %v1823_v31 = vpop.eup %1822  ;;  %v1104_v33 = vmul.f32 %v1821_v29, %v60_v30 }
 0x48c   :  { %v1080_v26 = vpop.f32.mrb[6].mxu1 }
 0x48d   :  { %v1081_v8 = vadd.f32 %v1080_v26, %v934_v22  ;;  %v1082_v52 = vpop.f32.mrb[7].mxu1 }
 0x48e   :  { %v1083_v27 = vadd.f32 %v1082_v52, %v938_v24 }
 0x48f   :  { %1824 = vtanh.f32 %v1081_v8 }
 0x490   :  { %v1259_v28 = vmul.f32 -1.442695, %v1083_v27 }
 0x492   :  { %1826 = vpow2.f32 %v1259_v28 }
 0x499   :  { %v1825_v25 = vpop.eup %1824 }
 0x49a   :  { %v1105_v32 = vmul.f32 %v1825_v25, %v1823_v31 }
 0x49c   :  { %v1827_v34 = vpop.eup %1826  ;;  %v1106_v19 = vadd.f32 %v1105_v32, %v1104_v33 }
 0x49d   :  { %v1101_v35 = vadd.f32 1.0, %v1827_v34 }
 0x49e   :  { %1828 = vtanh.f32 %v1106_v19 }
 0x49f   :  { %1830 = vrcp.f32 %v1101_v35 }
 0x4a8   :  { %v1829_v36 = vpop.eup %1828 }
 0x4a9   :  { %v1831_v37 = vpop.eup %1830 }
 0x4aa   :  { %v1108_v38 = vmul.f32 %v1831_v37, %v1829_v36 }
 0x4ac   :  { %1345 = vmatmul.mubr.f32.vlgmr.msra.gmra.mrb[4].mxu0 %v1108_v38  ;;  %v1215_v39 = vcombine.low %v1108_v38, %v1106_v19 }
 0x4ae   :  { %v1222_v59 = vrot.slane %v1215_v39, %v1221_v11 }
 0x57f   :  { %v1192_v42 = vpop.f32.mrb[4].mxu0 }
 0x580   :  { %v1193_v43 = vadd.f32 %v1192_v42, %v1125_v41  ;;  %v1346_v44 = vpop.f32.mrb[5].mxu0 }
 0x582   :  { %v1197_v45 = vsel %vm1196_vm8, %v1193_v43, -inf }
 0x583   :  { %1198 = vmax.xlane.f32.xlu0 %v1197_v45 }
 0x610   :  { %v1199_v46 = vpop.xlane.xlu0 %1198 }
 0x611   :  { %v1200_v47 = vsub.f32 %v1193_v43, %v1199_v46 }
 0x613   :  { %v1201_v7 = vmul.f32 1.442695, %v1200_v47 }
 0x615   :  { %1832 = vpow2.f32 %v1201_v7 }
 0x61f   :  { %v1833_v48 = vpop.eup %1832 }
 0x620   :  { %v1203_v49 = vsel %vm1196_vm8, %v1833_v48, 0.0 }
 0x621   :  { %1204 = vadd.xlane.f32.xlu0 %v1203_v49 }
 0x6ae   :  { %v1205_v50 = vpop.xlane.xlu0 %1204 }
 0x6af   :  { %1834 = vrcp.f32 %v1205_v50 }
 0x6b9   :  { %v1835_v21 = vpop.eup %1834 }
 0x6ba   :  { %v1207_v55 = vmul.f32 %v1835_v21, %v1833_v48 }
 0x6bc   :  { %v1209_v56 = vsel %vm1208_vm9, %v1207_v55, %v1193_v43 }
 0x6bd   :  { %v1211_v58 = vsel %vm1210_vm10, %v1209_v56, 0.0 }
 0x6be   :  { %v1229_v60 = vrot.slane %v1211_v58, %v1221_v11 }
 0x6c0   :  { %v1230_v61 = vcombine.low %v1222_v59, %v1229_v60 }
 0x6c2   :  { %v1237_v62 = vrot.slane %v1230_v61, %v1221_v11 }
 0x6c4   :  { %1243 = vst.msk [vmem:[%s2044_s4] sm:$0x7] %vm1241_vm11, %v1237_v62 }
 0x6c5   :  { %1248 = vsyncpa [#allocation3], 1 }
 0x6c6   :  { %1249 = vsyncpa [#allocation5], 1 }

</bundles_post_ra>
